<compile_context>
chip_gen: v7x
topology: tpu7x:2x2x1
jax: 0.10.0
libtpu: 0.0.40
codegen_flags: <defaults>
</compile_context>

<pallas_src>
import jax
import jax.numpy as jnp
import numpy as np
from jax.experimental import pallas as pl
from jax.experimental.pallas import tpu as pltpu


def _round_up(x, m):
    return ((x + m - 1) // m) * m


def _vmem_limit(nbytes):
    # Explicit scoped-VMEM budget: generous headroom, but under v7x's 64 MiB physical VMEM.
    return int(min(max(2 * nbytes, 16 << 20), 60 << 20))


def _fill_diag_one(x, row_offset):
    """x[r, c] = 1 where (row_offset + r) == c (global diagonal of the full matrix)."""
    rows = jax.lax.broadcasted_iota(jnp.int32, x.shape, 0) + row_offset
    cols = jax.lax.broadcasted_iota(jnp.int32, x.shape, 1)
    return jnp.where(rows == cols, jnp.float32(1.0), x)


def _adj_kernel(a_ref, utx_ref, adj_ref, adjt_ref):
    """Row-slab i of adj = fill_diag(|a @ (U.T @ X)|, 1); also emits the transposed slab.

    a_ref:    (TM, lr_p)   row slab of a = W[:, :lr] + W[:, lr:]
    utx_ref:  (lr_p, f_p)  full U.T @ X, resident in VMEM (single buffer)
    adj_ref:  (TM, f_p)    output slab of adj
    adjt_ref: (f_p, TM)    output column slab of adj.T (RHS of kernel 2)
    """
    i = pl.program_id(0)
    tm = adj_ref.shape[0]
    r0 = i * tm

    f_d = jnp.abs(jnp.dot(a_ref[...], utx_ref[...],
                          preferred_element_type=jnp.float32))
    adj = _fill_diag_one(f_d, r0)                      # fill_diagonal_(1)
    adj_ref[...] = adj.astype(adj_ref.dtype)
    adjt_ref[...] = adj.T.astype(adjt_ref.dtype)       # one total transpose across the grid


def _xo_kernel(adj_ref, adjt_ref, xo_ref):
    """Row-slab i of Xo = |fill_diag(adj @ adj.T, 1)|  (adj.T precomputed -> plain matmul).

    adj_ref:  (TM, hr stream)   (TM, f_p) pipelined row slab of adj
    adjt_ref: (f_p, hr_p)       full adj.T, resident in VMEM (single buffer)
    xo_ref:   (TM, hr_p)        output slab of Xo
    """
    i = pl.program_id(0)
    tm = xo_ref.shape[0]
    r0 = i * tm

    x = jnp.dot(adj_ref[...], adjt_ref[...], preferred_element_type=jnp.float32)
    x = _fill_diag_one(x, r0)                          # fill_diagonal_(1)
    # (Xo + Xo.T)/2 dropped: exactly symmetric (identical products, identical k-order).
    xo_ref[...] = jnp.abs(x).astype(xo_ref.dtype)


@jax.jit
def gsr_layer(A, X, W):
    """A: (lr, lr) f32, X: (lr, F) f32, W: (2*lr, hr) f32 with hr == 2*lr."""
    lr = A.shape[0]
    F = X.shape[1]
    two_lr, hr = W.shape
    assert two_lr == 2 * lr and hr == 2 * lr, "GSRLayer requires hr_dim == 2 * lr_dim"

    # TODO(synk): torch.linalg.eigh has no Pallas TPU equivalent; computed in plain XLA.
    _, U = jnp.linalg.eigh(A, UPLO="U", symmetrize_input=False)
    utx = (U.T @ X).astype(jnp.float32)            # fold U.T @ X outside the kernel

    # a = W @ [I; I] == W[:, :lr] + W[:, lr:]  (fused in the wrapper: one operand, half the DMA)
    a = (W[:, :lr] + W[:, lr:]).astype(jnp.float32)    # (hr, lr)

    # Padding: output lane dims (F, hr) to 128 -> unmasked lane-dense stores.
    # Contraction dim lr only to a sublane multiple of 8 (full-array blocks waive the 128 rule).
    # Padded zeros are inert in every contraction; the extra padded-diagonal ones only touch
    # rows/cols that are sliced off or Xo-diagonal entries that are overwritten to 1 anyway.
    lr_p = _round_up(lr, 8)
    f_p = _round_up(F, 128)
    hr_p = _round_up(hr, 128)

    a_p = jnp.pad(a, ((0, hr_p - hr), (0, lr_p - lr)))
    utx_p = jnp.pad(utx, ((0, lr_p - lr), (0, f_p - F)))

    TM = 256 if hr_p % 256 == 0 else 128           # bigger slabs once recompute is gone
    grid_n = hr_p // TM

    vmem_resident = pl.BlockSpec(memory_space=pltpu.MemorySpace.VMEM)  # whole array, 1 buffer

    # ---- kernel 1: adj = fill_diag(|a @ UtX|, 1)  (+ adj.T) -------------------------------
    k1_vmem = 4 * (2 * TM * lr_p + lr_p * f_p + 4 * TM * f_p)
    adj_p, adjt_p = pl.pallas_call(
        _adj_kernel,
        out_shape=(
            jax.ShapeDtypeStruct((hr_p, f_p), jnp.float32),   # adj   (padded)
            jax.ShapeDtypeStruct((f_p, hr_p), jnp.float32),   # adj.T (padded)
        ),
        grid_spec=pltpu.PrefetchScalarGridSpec(
            num_scalar_prefetch=0,
            grid=(grid_n,),
            in_specs=[
                pl.BlockSpec((TM, lr_p), lambda i: (i, 0)),   # row slab of a
                vmem_resident,                                # UtX, resident
            ],
            out_specs=(
                pl.BlockSpec((TM, f_p), lambda i: (i, 0)),
                pl.BlockSpec((f_p, TM), lambda i: (0, i)),
            ),
        ),
        compiler_params=pltpu.CompilerParams(
            dimension_semantics=("parallel",),
            vmem_limit_bytes=_vmem_limit(k1_vmem)),
        cost_estimate=pl.CostEstimate(
            flops=2 * hr_p * lr_p * f_p,
            transcendentals=0,
            bytes_accessed=4 * (hr_p * lr_p + lr_p * f_p + 2 * hr_p * f_p)),
    )(a_p, utx_p)

    # ---- kernel 2: Xo = |fill_diag(adj @ adj.T, 1)| ----------------------------------------
    k2_vmem = 4 * (2 * TM * f_p + f_p * hr_p + 2 * TM * hr_p)
    xo_p = pl.pallas_call(
        _xo_kernel,
        out_shape=jax.ShapeDtypeStruct((hr_p, hr_p), jnp.float32),
        grid_spec=pltpu.PrefetchScalarGridSpec(
            num_scalar_prefetch=0,
            grid=(grid_n,),
            in_specs=[
                pl.BlockSpec((TM, f_p), lambda i: (i, 0)),    # pipelined row slab of adj
                vmem_resident,                                # adj.T, resident
            ],
            out_specs=pl.BlockSpec((TM, hr_p), lambda i: (i, 0)),
        ),
        compiler_params=pltpu.CompilerParams(
            dimension_semantics=("parallel",),
            vmem_limit_bytes=_vmem_limit(k2_vmem)),
        cost_estimate=pl.CostEstimate(
            flops=2 * hr_p * f_p * hr_p,
            transcendentals=0,
            bytes_accessed=4 * (hr_p * f_p + f_p * hr_p + hr_p * hr_p)),
    )(adj_p, adjt_p)

    return adj_p[:hr, :F], xo_p[:hr, :hr]


def _reference(A, X, W):
    """Pure-JAX reference mirroring the PyTorch forward, for sanity checking."""
    lr_dim = A.shape[0]
    _, U_lr = jnp.linalg.eigh(A, UPLO="U", symmetrize_input=False)
    eye = jnp.eye(lr_dim, dtype=jnp.float32)
    s_d = jnp.concatenate([eye, eye], axis=0)
    a = W @ s_d
    b = a @ U_lr.T
    f_d = jnp.abs(b @ X)
    n = min(f_d.shape)
    idx = jnp.arange(n)
    f_d = f_d.at[idx, idx].set(1.0)
    adj = f_d
    Xo = adj @ adj.T
    Xo = (Xo + Xo.T) / 2
    m = Xo.shape[0]
    Xo = Xo.at[jnp.arange(m), jnp.arange(m)].set(1.0)
    return adj, jnp.abs(Xo)


def weight_variable_glorot(input_dim, output_dim, key):
    init_range = np.sqrt(6.0 / (input_dim + output_dim))
    return jax.random.uniform(
        key, (input_dim, output_dim), dtype=jnp.float32,
        minval=-init_range, maxval=init_range)


if __name__ == "__main__":
    lr_dim = 16
    hr_dim = 2 * lr_dim   # 32 — required by the module's matmul shapes
    feat = hr_dim         # X: (lr_dim, hr_dim) as in GSR-Net usage

    key = jax.random.PRNGKey(0)
    k_a, k_x, k_w = jax.random.split(key, 3)

    # Symmetric adjacency-like matrix A (eigh reads the upper triangle).
    A_raw = jax.random.uniform(k_a, (lr_dim, lr_dim), dtype=jnp.float32)
    A = (A_raw + A_raw.T) / 2.0
    X = jax.random.normal(k_x, (lr_dim, feat), dtype=jnp.float32)
    W = weight_variable_glorot(2 * lr_dim, hr_dim, k_w)  # nn.Parameter equivalent

    adj, x_out = gsr_layer(A, X, W)
    jax.block_until_ready((adj, x_out))

    adj_ref, x_ref = _reference(A, X, W)
    np.testing.assert_allclose(np.asarray(adj), np.asarray(adj_ref), rtol=1e-4, atol=1e-4)
    np.testing.assert_allclose(np.asarray(x_out), np.asarray(x_ref), rtol=1e-4, atol=1e-4)

    print("KERNEL_OK")
</pallas_src>

<mosaic_0001>
module attributes {stable_mosaic.version = 11 : i64} {
  func.func @_adj_kernel(%arg0: i32, %arg1: memref<128x16xf32, #tpu.memory_space<vmem>>, %arg2: memref<16x128xf32, #tpu.memory_space<vmem>>, %arg3: memref<128x128xf32, #tpu.memory_space<vmem>>, %arg4: memref<128x128xf32, #tpu.memory_space<vmem>>) attributes {dimension_semantics = [#tpu.dimension_semantics<parallel>], iteration_bounds = array<i64: 1>, scalar_prefetch = 0 : i64, scratch_operands = 0 : i64, tpu.core_type = #tpu.core_type<tc>, window_params = [{transform_indices = @transform_0, window_bounds = array<i64: 128, 16>}, {pipeline_mode = #tpu.pipeline_mode<synchronous>, transform_indices = @transform_1, window_bounds = array<i64: 16, 128>}, {transform_indices = @transform_2, window_bounds = array<i64: 128, 128>}, {transform_indices = @transform_3, window_bounds = array<i64: 128, 128>}]} {
    %c128_i32 = arith.constant 128 : i32
    %0 = arith.muli %arg0, %c128_i32 : i32
    %c0 = arith.constant 0 : index
    %c0_0 = arith.constant 0 : index
    %1 = vector.load %arg1[%c0, %c0_0] : memref<128x16xf32, #tpu.memory_space<vmem>>, vector<128x16xf32>
    %c0_1 = arith.constant 0 : index
    %c0_2 = arith.constant 0 : index
    %2 = vector.load %arg2[%c0_1, %c0_2] : memref<16x128xf32, #tpu.memory_space<vmem>>, vector<16x128xf32>
    %cst = arith.constant dense<0.000000e+00> : vector<128x128xf32>
    %3 = tpu.matmul %1, %2, %cst {dimension_numbers = #tpu.dot_dimension_numbers<[1], [0], [0], [1], [0, 0, 1, 1], [], []>} : vector<128x16xf32>, vector<16x128xf32>, vector<128x128xf32> -> vector<128x128xf32>
    %4 = math.absf %3 : vector<128x128xf32>
    %5 = tpu.iota {dimensions = array<i32: 0>} : vector<128x128xi32>
    %6 = vector.broadcast %0 : i32 to vector<128x128xi32>
    %7 = arith.addi %5, %6 : vector<128x128xi32>
    %8 = tpu.iota {dimensions = array<i32: 1>} : vector<128x128xi32>
    %9 = arith.cmpi eq, %7, %8 : vector<128x128xi32>
    %cst_3 = arith.constant 1.000000e+00 : f32
    %10 = vector.broadcast %cst_3 : f32 to vector<128x128xf32>
    %11 = arith.select %9, %10, %4 : vector<128x128xi1>, vector<128x128xf32>
    %c0_4 = arith.constant 0 : index
    %c0_5 = arith.constant 0 : index
    %12 = vector.load %arg3[%c0_4, %c0_5] : memref<128x128xf32, #tpu.memory_space<vmem>>, vector<128x128xf32>
    tpu.vector_store %arg3[%c0_4, %c0_5], %11 {strides = array<i32>} : memref<128x128xf32, #tpu.memory_space<vmem>>, vector<128x128xf32>,
    %13 = tpu.transpose %11, [1, 0] : vector<128x128xf32> -> vector<128x128xf32>
    %c0_6 = arith.constant 0 : index
    %c0_7 = arith.constant 0 : index
    %14 = vector.load %arg4[%c0_6, %c0_7] : memref<128x128xf32, #tpu.memory_space<vmem>>, vector<128x128xf32>
    tpu.vector_store %arg4[%c0_6, %c0_7], %13 {strides = array<i32>} : memref<128x128xf32, #tpu.memory_space<vmem>>, vector<128x128xf32>,
    return
  }
  func.func @transform_0(%arg0: i32) -> (i32, i32) {
    %c0_i32 = arith.constant 0 : i32
    %c0_i32_0 = arith.constant 0 : i32
    return %arg0, %c0_i32 : i32, i32
  }
  func.func @transform_1(%arg0: i32) -> (i32, i32) {
    %c0_i32 = arith.constant 0 : i32
    %c0_i32_0 = arith.constant 0 : i32
    %c0_i32_1 = arith.constant 0 : i32
    return %c0_i32, %c0_i32_0 : i32, i32
  }
  func.func @transform_2(%arg0: i32) -> (i32, i32) {
    %c0_i32 = arith.constant 0 : i32
    %c0_i32_0 = arith.constant 0 : i32
    return %arg0, %c0_i32 : i32, i32
  }
  func.func @transform_3(%arg0: i32) -> (i32, i32) {
    %c0_i32 = arith.constant 0 : i32
    %c0_i32_0 = arith.constant 0 : i32
    return %c0_i32, %arg0 : i32, i32
  }
}

module attributes {stable_mosaic.version = 11 : i64} {
  func.func @_xo_kernel(%arg0: i32, %arg1: memref<128x128xf32, #tpu.memory_space<vmem>>, %arg2: memref<128x128xf32, #tpu.memory_space<vmem>>, %arg3: memref<128x128xf32, #tpu.memory_space<vmem>>) attributes {dimension_semantics = [#tpu.dimension_semantics<parallel>], iteration_bounds = array<i64: 1>, scalar_prefetch = 0 : i64, scratch_operands = 0 : i64, tpu.core_type = #tpu.core_type<tc>, window_params = [{transform_indices = @transform_0, window_bounds = array<i64: 128, 128>}, {pipeline_mode = #tpu.pipeline_mode<synchronous>, transform_indices = @transform_1, window_bounds = array<i64: 128, 128>}, {transform_indices = @transform_2, window_bounds = array<i64: 128, 128>}]} {
    %c128_i32 = arith.constant 128 : i32
    %0 = arith.muli %arg0, %c128_i32 : i32
    %c0 = arith.constant 0 : index
    %c0_0 = arith.constant 0 : index
    %1 = vector.load %arg1[%c0, %c0_0] : memref<128x128xf32, #tpu.memory_space<vmem>>, vector<128x128xf32>
    %c0_1 = arith.constant 0 : index
    %c0_2 = arith.constant 0 : index
    %2 = vector.load %arg2[%c0_1, %c0_2] : memref<128x128xf32, #tpu.memory_space<vmem>>, vector<128x128xf32>
    %cst = arith.constant dense<0.000000e+00> : vector<128x128xf32>
    %3 = tpu.matmul %1, %2, %cst {dimension_numbers = #tpu.dot_dimension_numbers<[1], [0], [0], [1], [0, 0, 1, 1], [], []>} : vector<128x128xf32>, vector<128x128xf32>, vector<128x128xf32> -> vector<128x128xf32>
    %4 = tpu.iota {dimensions = array<i32: 0>} : vector<128x128xi32>
    %5 = vector.broadcast %0 : i32 to vector<128x128xi32>
    %6 = arith.addi %4, %5 : vector<128x128xi32>
    %7 = tpu.iota {dimensions = array<i32: 1>} : vector<128x128xi32>
    %8 = arith.cmpi eq, %6, %7 : vector<128x128xi32>
    %cst_3 = arith.constant 1.000000e+00 : f32
    %9 = vector.broadcast %cst_3 : f32 to vector<128x128xf32>
    %10 = arith.select %8, %9, %3 : vector<128x128xi1>, vector<128x128xf32>
    %11 = math.absf %10 : vector<128x128xf32>
    %c0_4 = arith.constant 0 : index
    %c0_5 = arith.constant 0 : index
    %12 = vector.load %arg3[%c0_4, %c0_5] : memref<128x128xf32, #tpu.memory_space<vmem>>, vector<128x128xf32>
    tpu.vector_store %arg3[%c0_4, %c0_5], %11 {strides = array<i32>} : memref<128x128xf32, #tpu.memory_space<vmem>>, vector<128x128xf32>,
    return
  }
  func.func @transform_0(%arg0: i32) -> (i32, i32) {
    %c0_i32 = arith.constant 0 : i32
    %c0_i32_0 = arith.constant 0 : i32
    return %arg0, %c0_i32 : i32, i32
  }
  func.func @transform_1(%arg0: i32) -> (i32, i32) {
    %c0_i32 = arith.constant 0 : i32
    %c0_i32_0 = arith.constant 0 : i32
    %c0_i32_1 = arith.constant 0 : i32
    return %c0_i32, %c0_i32_0 : i32, i32
  }
  func.func @transform_2(%arg0: i32) -> (i32, i32) {
    %c0_i32 = arith.constant 0 : i32
    %c0_i32_0 = arith.constant 0 : i32
    return %arg0, %c0_i32 : i32, i32
  }
}

</mosaic_0001>

<bundles_post_ra>
// kernel: custom-call.2
= control target key start
LH: loop header
LB: loop body
LE: loop exit
PB: predicated region body
PF: predicated region fallthrough
CT: control target
= control target key end

     0   :  { %s2375_s30 = smov [#allocation0]   ;;  %s2724_s0 = inlined_call_operand.vmem [shape: f32[8,8], index: 0, kind: input, shape index: {}]   ;;  %s2725_s1 = inlined_call_operand.vmem [shape: f32[8,8], index: 1, kind: input, shape index: {}]   ;;  %s2726_s2 = inlined_call_operand.vmem [shape: f32[8,8], index: 2, kind: input, shape index: {}]   ;;  %s2727_s3 = inlined_call_operand.vmem [shape: f32[8,8], index: 3, kind: input, shape index: {}]   ;;  %s2728_s4 = inlined_call_operand.vmem [shape: f32[8], index: 4, kind: output, shape index: {0}]   ;;  %s2729_s5 = inlined_call_operand.vmem [shape: f32[8], index: 5, kind: output, shape index: {1}]   ;;  %s2730_s6 = inlined_call_operand.vmem [shape: f32[8,8], index: 6, kind: output, shape index: {2}]   ;;  %s2731_s7 = inlined_call_operand.vmem [shape: f32[8,8], index: 7, kind: output, shape index: {3}]   ;;  %s2732_s8 = inlined_call_operand.vmem [shape: f32[8,8], index: 8, kind: output, shape index: {4}]   ;;  %s2733_s9 = inlined_call_operand.vmem [shape: f32[8,8], index: 9, kind: output, shape index: {5}]  }
   0x1   :  { %s2379_s12 = smov %s2724_s0  }
   0x2 LB: > { %v58_v0 = vld [vmem:[%s2381_s12] sm:$0xff]  ;;  %s60_s12 = scalar_lea.vmem %s2381_s12, 8   ;;  %s2381_s12 = sphi %s2379_s12, %s60_s12   ;;  %s2377_s30 = sphi %s2375_s30, %s61_s30  }
   0x3   : > { %59 = vst [vmem:[%s2377_s30] sm:$0xff] %v58_v0  ;;  %s61_s30 = scalar_lea.vmem %s2377_s30, 8   ;;  %p55_p0 = scmp.gt.s32.totalorder %s60_s12, %s2724_s0 }
   0x4   :  { %s2383_s15 = smov (%p55_p0), [#allocation1]   ;;  %s2387_s18 = smov (%p55_p0), %s2725_s1  }
   0x5   :  { %57 = sbr.rel (!%p55_p0) target bundleno = 2 (0x2), region = 358 }
   0xc LB: > { %v120_v1 = vld [vmem:[%s2389_s18] sm:$0xff]  ;;  %s122_s18 = scalar_lea.vmem %s2389_s18, 8   ;;  %s2389_s18 = sphi %s2387_s18, %s122_s18   ;;  %s2385_s15 = sphi %s2383_s15, %s123_s15  }
   0xd   : > { %121 = vst [vmem:[%s2385_s15] sm:$0xff] %v120_v1  ;;  %s123_s15 = scalar_lea.vmem %s2385_s15, 8   ;;  %p117_p1 = scmp.gt.s32.totalorder %s122_s18, %s2725_s1 }
   0xe   :  { %s2391_s0 = smov (%p117_p1), [#allocation2]   ;;  %s2395_s23 = smov (%p117_p1), %s2726_s2  }
   0xf   :  { %119 = sbr.rel (!%p117_p1) target bundleno = 12 (0xc), region = 380 }
  0x16 LB: > { %v182_v2 = vld [vmem:[%s2397_s23] sm:$0xff]  ;;  %s184_s23 = scalar_lea.vmem %s2397_s23, 8   ;;  %s2397_s23 = sphi %s2395_s23, %s184_s23   ;;  %s2393_s0 = sphi %s2391_s0, %s185_s0  }
  0x17   : > { %183 = vst [vmem:[%s2393_s0] sm:$0xff] %v182_v2  ;;  %s185_s0 = scalar_lea.vmem %s2393_s0, 8   ;;  %p179_p2 = scmp.gt.s32.totalorder %s184_s23, %s2726_s2 }
  0x18   :  { %s2399_s1 = smov (%p179_p2), [#allocation3]   ;;  %s2403_s28 = smov (%p179_p2), %s2727_s3  }
  0x19   :  { %181 = sbr.rel (!%p179_p2) target bundleno = 22 (0x16), region = 402 }
  0x20 LB: > { %v244_v3 = vld [vmem:[%s2405_s28] sm:$0xff]  ;;  %s246_s28 = scalar_lea.vmem %s2405_s28, 8   ;;  %s2405_s28 = sphi %s2403_s28, %s246_s28   ;;  %s2401_s1 = sphi %s2399_s1, %s247_s1  }
  0x21   : > { %245 = vst [vmem:[%s2401_s1] sm:$0xff] %v244_v3  ;;  %s247_s1 = scalar_lea.vmem %s2401_s1, 8   ;;  %p241_p3 = scmp.gt.s32.totalorder %s246_s28, %s2727_s3 }
  0x22   :  { %s259_s2 = smov (%p241_p3), [#allocation12]  ;;  %v260_v4 = vld [vmem:[#allocation0] sm:$0xff] (%p241_p3)  ;;  %s262_s10 = smov (%p241_p3), [#allocation13]  ;;  %v263_v5 = vld [vmem:[#allocation1] sm:$0xff] (%p241_p3)  ;;  %v266_v6 = vld [vmem:[#allocation2] sm:$0xff] (%p241_p3)  ;;  %v276_v7 = vlaneseq (%p241_p3)  ;;  %v2447_v9 = vmov (%p241_p3), 0.0  }
  0x23   :  { %243 = sbr.rel (!%p241_p3) target bundleno = 32 (0x20), region = 424  ;;  %261 = vst [vmem:[%s259_s2] sm:$0xff] (%p241_p3), %v260_v4  ;;  %264 = vst [vmem:[%s262_s10] sm:$0xff] (%p241_p3), %v263_v5  ;;  %s265_s11 = smov (%p241_p3), [#allocation14] }
  0x24   :  { %s268_s12 = smov (%p241_p3), [#allocation15]  ;;  %271 = vst [vmem:[#allocation8] sm:$0xff] (%p241_p3), %v2447_v9  ;;  %272 = vst [vmem:[#allocation9] sm:$0xff] (%p241_p3), %v2447_v9  ;;  %v2524_v10 = vand.u32 (%p241_p3), 127, %v276_v7  ;;  %v2526_v11 = vshrl.u32 (%p241_p3), %v276_v7, 7  ;;  %s275_s3 = smov (%p241_p3), [#allocation8] }
  0x25   :  { %273 = vst [vmem:[#allocation10] sm:$0xff] (%p241_p3), %v2447_v9  ;;  %274 = vst [vmem:[#allocation11] sm:$0xff] (%p241_p3), %v2447_v9  ;;  %s288_s13 = smov (%p241_p3), [#allocation11]  ;;  %s1401_s14 = smov (%p241_p3), [#allocation12] }
  0x26   :  { %267 = vst [vmem:[%s265_s11] sm:$0xff] (%p241_p3), %v266_v6  ;;  %v278_v10 = vmov (%p241_p3), %v2524_v10  ;;  %v281_v11 = vmov (%p241_p3), %v2526_v11  ;;  %vm1405_vm2 = vcmp.lt.s32.totalorder (%p241_p3), %v2524_v10, 8  ;;  %s1418_s15 = smov (%p241_p3), [#allocation13]  ;;  %s1435_s16 = smov (%p241_p3), [#allocation14] }
  0x27   :  { %v291_v10 = vmov (%p241_p3), %v2524_v10  ;;  %v294_v11 = vmov (%p241_p3), %v2526_v11  ;;  %vm285_vm0 = vcmp.eq.s32.totalorder (%p241_p3), %v281_v11, %v278_v10  ;;  %s1452_s17 = smov (%p241_p3), [#allocation15] }
  0x28   :  { %v269_v8 = vld [vmem:[#allocation3] sm:$0xff] (%p241_p3)  ;;  %vm298_vm1 = vcmp.eq.s32.totalorder (%p241_p3), %v294_v11, %v291_v10  ;;  %v1397_v10 = vmov (%p241_p3), %v2524_v10  ;;  %v1400_v11 = vmov (%p241_p3), %v2526_v11 }
  0x29   :  { %270 = vst [vmem:[%s268_s12] sm:$0xff] (%p241_p3), %v269_v8  ;;  %vm1410_vm3 = vcmp.eq.s32.totalorder (%p241_p3), %v1400_v11, %v1397_v10  ;;  %v1448_v10 = vmov (%p241_p3), %v2524_v10  ;;  %v1417_v11 = vmov (%p241_p3), %v2526_v11 }
  0x2a   :  { %v1407_v16 = vld [vmem:[%s1401_s14] sm:$0xff]  ;;  %v1414_v10 = vmov %v2524_v10  ;;  %v1451_v11 = vmov %v2526_v11 }
  0x2b   :  { %v282_v12 = vld [vmem:[%s275_s3] sm:$0xff]  ;;  %v1408_v18 = vsel %vm1405_vm2, %v1407_v16, 0.0  ;;  %v1431_v10 = vmov %v2524_v10  ;;  %v1434_v11 = vmov %v2526_v11  ;;  %vm1461_vm4 = vcmp.eq.s32.totalorder %v1451_v11, %v1448_v10 }
  0x2c   :  { %v295_v13 = vld [vmem:[%s288_s13] sm:$0xff]  ;;  %v286_v14 = vsel %vm285_vm0, 1.0, %v282_v12  ;;  %v1409_v22 = vmul.f32 %v1408_v18, %v1408_v18 }
  0x2d   :  { %v299_v15 = vsel %vm298_vm1, 1.0, %v295_v13  ;;  %287 = vst [vmem:[%s275_s3] sm:$0xff] %v286_v14  ;;  %v1424_v17 = vld [vmem:[%s1418_s15] sm:$0xff] }
  0x2e   :  { %300 = vst [vmem:[%s288_s13] sm:$0xff] %v299_v15  ;;  %v1425_v19 = vsel %vm1405_vm2, %v1424_v17, 0.0  ;;  %v1441_v20 = vld [vmem:[%s1435_s16] sm:$0xff]  ;;  %v1411_v29 = vsel %vm1410_vm3, 0.0, %v1409_v22 }
  0x2f   :  { %v1426_v23 = vmul.f32 %v1425_v19, %v1425_v19  ;;  %v1442_v24 = vsel %vm1405_vm2, %v1441_v20, 0.0 }
  0x30   :  { %v1458_v21 = vld [vmem:[%s1452_s17] sm:$0xff]  ;;  %v1443_v26 = vmul.f32 %v1442_v24, %v1442_v24 }
  0x31   :  { %v1459_v25 = vsel %vm1405_vm2, %v1458_v21, 0.0  ;;  %v1428_v27 = vadd.f32 %v1426_v23, %v1409_v22  ;;  %v1427_v30 = vadd.f32 %v1426_v23, %v1411_v29 }
  0x32   :  { %v1460_v28 = vmul.f32 %v1459_v25, %v1459_v25 }
  0x33   :  { %v1445_v31 = vadd.f32 %v1443_v26, %v1428_v27  ;;  %v1444_v32 = vadd.f32 %v1443_v26, %v1427_v30 }
  0x34   :  { %v1462_v33 = vsel %vm1461_vm4, 0.0, %v1460_v28 }
  0x35   :  { %v1464_v34 = vadd.f32 %v1460_v28, %v1445_v31  ;;  %v1463_v35 = vadd.f32 %v1462_v33, %v1444_v32 }
  0x37   :  { %1465 = vadd.xlane.f32.xlu0 %v1464_v34 }
  0x3b   :  { %1473 = vadd.xlane.f32.xlu0 %v1463_v35 }
  0xc4   :  { %v1466_v36 = vpop.xlane.xlu0 %1465 }
  0xc5   :  { %v1467_v37 = vrot.slane %v1466_v36, 4 }
  0xc7   :  { %v1468_v38 = vadd.f32 %v1467_v37, %v1466_v36 }
  0xc8   :  { %v1474_v39 = vpop.xlane.xlu0 %1473 }
  0xc9   :  { %v1469_v40 = vrot.slane %v1468_v38, 2  ;;  %v1475_v41 = vrot.slane %v1474_v39, 4 }
  0xcb   :  { %v1476_v42 = vadd.f32 %v1475_v41, %v1474_v39  ;;  %v1470_v43 = vadd.f32 %v1469_v40, %v1468_v38 }
  0xcd   :  { %v1477_v44 = vrot.slane %v1476_v42, 2  ;;  %v1471_v46 = vrot.slane %v1470_v43, 1 }
  0xcf   :  { %v1478_v45 = vadd.f32 %v1477_v44, %v1476_v42  ;;  %v1472_v49 = vadd.f32 %v1471_v46, %v1470_v43 }
  0xd1   :  { %v1479_v47 = vrot.slane %v1478_v45, 1 }
  0xd3   :  { %v1480_v48 = vadd.f32 %v1479_v47, %v1478_v45 }
  0xd5   :  { %1656 = vpush %v1480_v48 }
  0xd6   :  { %1658 = vpush %v1472_v49 }
 0x106   :  { %s1657_s18 = spop %1656 }
 0x107   :  { %s1659_s19 = spop %1658 }
 0x108   :  { %s1483_s20 = smul.f32 1e-10, %s1659_s19 }
 0x10a   :  { %p1484_p4 = scmp.le.f32.partialorder %s1657_s18, %s1483_s20 }
 0x10b   :  { %s2550_s0 = smov (!%p1484_p4), 0  }
 0x10c   :  { %1487 = sbr.rel (%p1484_p4) target bundleno = 950 (0x3b6), region = 440 }
 0x113 LB: > { %s2555_s21 = smov 0   ;;  %s2409_s0 = sphi %s2550_s0, %s2734_s0  }
 0x114 LB: >> { %s405_s22 = smov [#allocation12]  ;;  %v409_v10 = vmov %v2524_v10  ;;  %v412_v11 = vmov %v2526_v11  ;;  %s425_s23 = smov [#allocation13]  ;;  %vm728_vm14 = vcmp.eq.s32.totalorder %v2526_v11, 0  ;;  %vm740_vm15 = vcmp.eq.s32.totalorder %v2526_v11, 7  ;;  %s2413_s21 = sphi %s2555_s21, %s404_s21  }
 0x115   : >> { %v429_v10 = vmov %v2524_v10  ;;  %v432_v11 = vmov %v2526_v11  ;;  %v413_v50 = vld [vmem:[%s405_s22] sm:$0xff]  ;;  %vm416_vm5 = vcmp.eq.s32.totalorder %v412_v11, %v409_v10  ;;  %s445_s24 = smov [#allocation15]  ;;  %s406_s25 = smov [#allocation16] }
 0x116   : >> { %vm436_vm6 = vcmp.eq.s32.totalorder %v432_v11, %v429_v10  ;;  %v449_v10 = vmov %v2524_v10  ;;  %v452_v11 = vmov %v2526_v11  ;;  %v417_v51 = vsel %vm416_vm5, %v413_v50, 0.0  ;;  %v433_v52 = vld [vmem:[%s425_s23] sm:$0xff]  ;;  %s426_s1 = smov [#allocation17]  ;;  %s446_s26 = smov [#allocation18] }
 0x117   : >> { %vm456_vm7 = vcmp.eq.s32.totalorder %v452_v11, %v449_v10  ;;  %v418_v53 = vrot.slane %v417_v51, 4  ;;  %v437_v54 = vsel %vm436_vm6, %v433_v52, 0.0  ;;  %v453_v55 = vld [vmem:[%s445_s24] sm:$0xff]  ;;  %s469_s27 = smov [#allocation17]  ;;  %s467_s28 = smov [#allocation16]  ;;  %v518_v10 = vmov %v2524_v10 }
 0x118   : >> { %v438_v56 = vrot.slane %v437_v54, 4  ;;  %v457_v57 = vsel %vm456_vm7, %v453_v55, 0.0  ;;  %s471_s29 = smov [#allocation18]  ;;  %s506_s30 = smov [#allocation19]  ;;  %v521_v11 = vmov %v2526_v11  ;;  %v533_v10 = vmov %v2524_v10 }
 0x119   : >> { %v419_v58 = vadd.f32 %v418_v53, %v417_v51  ;;  %v458_v59 = vrot.slane %v457_v57, 4  ;;  %s508_s2 = smov [#allocation20]  ;;  %s465_s10 = smov [#allocation21]  ;;  %v536_v11 = vmov %v2526_v11  ;;  %vm523_vm12 = vcmp.eq.s32.totalorder %v521_v11, %v518_v10 }
 0x11a   : >> { %v439_v60 = vadd.f32 %v438_v56, %v437_v54  ;;  %s466_s11 = smov [#allocation22]  ;;  %s510_s10 = smov %s465_s10  ;;  %vm538_vm13 = vcmp.eq.s32.totalorder %v536_v11, %v533_v10  ;;  %v631_v10 = vmov %v2524_v10  ;;  %v634_v11 = vmov %v2526_v11 }
 0x11b   : >> { %v420_v61 = vrot.slane %v419_v58, 2  ;;  %v459_v62 = vadd.f32 %v458_v59, %v457_v57  ;;  %s512_s11 = smov %s466_s11  ;;  %s514_s12 = smov [#allocation21]  ;;  %v604_v10 = vmov %v2524_v10  ;;  %v607_v11 = vmov %v2526_v11 }
 0x11c   : >> { %v440_v63 = vrot.slane %v439_v60, 2  ;;  %s529_s3 = smov [#allocation22]  ;;  %s527_s13 = smov [#allocation23]  ;;  %v645_v10 = vmov %v2524_v10  ;;  %v648_v11 = vmov %v2526_v11  ;;  %vm638_vm0 = vcmp.eq.s32.totalorder %v634_v11, %v631_v10 }
 0x11d   : >> { %v421_v0 = vadd.f32 %v420_v61, %v419_v58  ;;  %v460_v1 = vrot.slane %v459_v62, 2  ;;  %s544_s14 = smov [#allocation23]  ;;  %s2570_s15 = smov [#allocation12]  ;;  %v618_v10 = vmov %v2524_v10  ;;  %v621_v11 = vmov %v2526_v11 }
 0x11e   : >> { %v441_v2 = vadd.f32 %v440_v63, %v439_v60  ;;  %s542_s16 = smov [#allocation24]  ;;  %s2572_s17 = smov [#allocation13]  ;;  %v552_v49 = vld [vmem:[%s2570_s15] sm:$0xff]  ;;  %vm612_vm1 = vcmp.eq.s32.totalorder %v607_v11, %v604_v10  ;;  %vm653_vm3 = vcmp.eq.s32.totalorder %v648_v11, %v645_v10  ;;  %vm625_vm4 = vcmp.eq.s32.totalorder %v621_v11, %v618_v10 }
 0x11f   : >> { %v422_v3 = vrot.slane %v421_v0, 1  ;;  %v461_v4 = vadd.f32 %v460_v1, %v459_v62  ;;  %s2574_s18 = smov [#allocation15]  ;;  %s768_s19 = smov [#allocation23]  ;;  %v553_v50 = vld [vmem:[%s2572_s17] sm:$0xff]  ;;  %vm667_vm5 = vcmp.eq.s32.totalorder %v2524_v10, 0  ;;  %vm671_vm6 = vcmp.eq.s32.totalorder %v2524_v10, 1 }
 0x120   : >> { %v442_v5 = vrot.slane %v441_v2, 1  ;;  %s2576_s20 = smov [#allocation8]  ;;  %s2578_s22 = smov [#allocation9]  ;;  %v555_v51 = vld [vmem:[%s2574_s18] sm:$0xff]  ;;  %vm684_vm7 = vcmp.eq.s32.totalorder %v2524_v10, 7 }
 0x121   : >> { %v423_v6 = vadd.f32 %v422_v3, %v421_v0  ;;  %v462_v7 = vrot.slane %v461_v4, 1  ;;  %s2580_s23 = smov [#allocation10]  ;;  %s2583_s24 = smov [#allocation11]  ;;  %v776_v52 = vld [vmem:[%s2576_s20] sm:$0xff] }
 0x122   : >> { %v443_v8 = vadd.f32 %v442_v5, %v441_v2  ;;  %v777_v53 = vld [vmem:[%s2578_s22] sm:$0xff]  ;;  %s404_s21 = sadd.s32 1, %s2413_s21  }
 0x123   : >> { %424 = vst [vmem:[%s406_s25] sm:$0x1] %v423_v6  ;;  %v463_v9 = vadd.f32 %v462_v7, %v461_v4  ;;  %s2585_s25 = smov [#allocation14]  ;;  %v778_v56 = vld [vmem:[%s2580_s23] sm:$0xff]  ;;  %p401_p5 = scmp.ge.s32.totalorder %s404_s21, 15  }
 0x124   : >> { %444 = vst [vmem:[%s426_s1] sm:$0x1] %v443_v8  ;;  %v779_v57 = vld [vmem:[%s2583_s24] sm:$0xff]  ;;  %s546_s1 = smov [#allocation24]  ;;  %v305_v10 = vmov (%p401_p5), %v2524_v10  ;;  %v308_v11 = vmov (%p401_p5), %v2526_v11 }
 0x125   : >> { %464 = vst [vmem:[%s446_s26] sm:$0x1] %v463_v9  ;;  %s770_s26 = smov [#allocation24]  ;;  %v554_v58 = vld [vmem:[%s2585_s25] sm:$0xff]  ;;  %v358_v10 = vmov (%p401_p5), %v2524_v10 }
 0x12a   : >> { %v468_v14 = vld [vmem:[%s467_s28] sm:$0xff]  ;;  %s797_s28 = smov [#allocation10] }
 0x12b   : >> { %v470_v12 = vld [vmem:[%s469_s27] sm:$0xff]  ;;  %v491_v27 = vand.u32 2147483647, %v468_v14  ;;  %s796_s27 = smov [#allocation8] }
 0x12c   : >> { %v474_v13 = vmul.f32 2.0, %v470_v12  ;;  %v472_v15 = vld [vmem:[%s471_s29] sm:$0xff]  ;;  %v492_v32 = vand.u32 2147483647, %v470_v12  ;;  %s572_s29 = smov [#allocation21] }
 0x12d   : >> { %v473_v16 = vsub.f32 %v472_v15, %v468_v14  ;;  %v493_v28 = vand.u32 2147483647, %v472_v15 }
 0x12e   : >> { %2135 = vrcp.f32 %v474_v13 }
 0x12f   : >> { %v494_v31 = vmin.f32 %v491_v27, %v493_v28 }
 0x131   : >> { %v495_v33 = vmul.f32 1.1920929e-08, %v494_v31 }
 0x133   : >> { %vm496_vm11 = vcmp.le.f32.partialorder %v492_v32, %v495_v33 }
 0x138   : >> { %v2136_v17 = vpop.eup %2135 }
 0x139   : >> { %v476_v18 = vmul.f32 %v2136_v17, %v473_v16 }
 0x13b   : >> { %v478_v19 = vmul.f32 %v476_v18, %v476_v18  ;;  %vm477_vm10 = vcmp.ge.f32.partialorder %v476_v18, 0.0 }
 0x13d   : >> { %v479_v20 = vadd.f32 1.0, %v478_v19 }
 0x13f   : >> { %2137 = vrsqrt.f32 %v479_v20  ;;  %vm482_vm8 = vcmp.eq.f32.partialorder %v479_v20, inf  ;;  %v485_v22 = vand.u32 2147483648, %v479_v20  ;;  %vm484_vm9 = vcmp.eq.f32.partialorder %v479_v20, 0.0 }
 0x149   : >> { %v2138_v21 = vpop.eup %2137 }
 0x14a   : >> { %v481_v23 = vmul.f32 %v2138_v21, %v479_v20 }
 0x14c   : >> { %v483_v24 = vsel %vm482_vm8, %v479_v20, %v481_v23  ;;  %vm320_vm8 = vcmp.eq.s32.totalorder (%p401_p5), %v308_v11, %v305_v10  ;;  %v361_v11 = vmov (%p401_p5), %v2526_v11  ;;  %v324_v10 = vmov (%p401_p5), %v2524_v10 }
 0x14d   : >> { %v486_v25 = vsel %vm484_vm9, %v485_v22, %v483_v24  ;;  %v327_v11 = vmov (%p401_p5), %v2526_v11  ;;  %v341_v10 = vmov (%p401_p5), %v2524_v10  ;;  %vm373_vm9 = vcmp.eq.s32.totalorder (%p401_p5), %v361_v11, %v358_v10 }
 0x14e   : >> { %v487_v26 = vxor.u32 2147483648, %v486_v25  ;;  %v344_v11 = vmov (%p401_p5), %v2526_v11 }
 0x150   : >> { %v488_v29 = vsel %vm477_vm10, %v486_v25, %v487_v26 }
 0x151   : >> { %v489_v30 = vadd.f32 %v488_v29, %v476_v18 }
 0x153   : >> { %2139 = vrcp.f32 %v489_v30 }
 0x15d   : >> { %v2140_v34 = vpop.eup %2139 }
 0x15e   : >> { %v497_v35 = vsel %vm496_vm11, 0.0, %v2140_v34 }
 0x15f   : >> { %v498_v36 = vmul.f32 %v497_v35, %v497_v35  ;;  %v502_v37 = vmul.f32 %v497_v35, %v470_v12 }
 0x161   : >> { %v499_v38 = vadd.f32 1.0, %v498_v36  ;;  %v503_v39 = vsub.f32 %v468_v14, %v502_v37  ;;  %v505_v40 = vadd.f32 %v502_v37, %v472_v15 }
 0x163   : >> { %2141 = vrsqrt.f32 %v499_v38  ;;  %507 = vst [vmem:[%s506_s30] sm:$0xff] %v503_v39  ;;  %509 = vst [vmem:[%s508_s2] sm:$0xff] %v505_v40  ;;  %s574_s30 = smov [#allocation22]  ;;  %s2602_s2 = smov [#allocation9] }
 0x16d   : >> { %v2142_v41 = vpop.eup %2141 }
 0x16e   : >> { %511 = vst [vmem:[%s510_s10] sm:$0xff] %v2142_v41  ;;  %v501_v42 = vmul.f32 %v2142_v41, %v497_v35  ;;  %s2604_s10 = smov [#allocation11] }
 0x170   : >> { %513 = vst [vmem:[%s512_s11] sm:$0xff] %v501_v42  ;;  %s2608_s11 = smov [#allocation14] }
 0x175   : >> { %v515_v43 = vld [vmem:[%s514_s12] ss:$0 sm:$0xff]  ;;  %s2610_s12 = smov [#allocation15] }
 0x176   : >> { %v524_v44 = vsel %vm523_vm12, %v515_v43, 0.0  ;;  %v573_v23 = vld [vmem:[%s572_s29] ss:$0 sm:$0xff]  ;;  %s745_s29 = smov [#allocation15] }
 0x177   : >> { %525 = vadd.xlane.f32.xlu0 %v524_v44  ;;  %v530_v45 = vld [vmem:[%s529_s3] ss:$0 sm:$0xff]  ;;  %s2612_s3 = smov [#allocation12] }
 0x178   : >> { %v539_v46 = vsel %vm538_vm13, %v530_v45, 0.0  ;;  %v575_v24 = vld [vmem:[%s574_s30] ss:$0 sm:$0xff]  ;;  %s844_s30 = sadd.s32 (%p401_p5), 1, %s2409_s0  }
 0x179   : > { %p397_p6 = scmp.ge.s32.totalorder (%p401_p5), %s844_s30, 15  ;;  %s2734_s0 = smov (%p401_p5), %s844_s30 }
 0x17b   : >> { %540 = vadd.xlane.f32.xlu0 %v539_v46 }
 0x204   : >> { %v526_v47 = vpop.xlane.xlu0 %525 }
 0x205   : >> { %528 = vst [vmem:[%s527_s13] sm:$0xff] %v526_v47  ;;  %s2614_s13 = smov [#allocation13] }
 0x208   : >> { %v541_v48 = vpop.xlane.xlu0 %540 }
 0x209   : >> { %543 = vst [vmem:[%s542_s16] sm:$0xff] %v541_v48  ;;  %s628_s16 = smov [#allocation14] }
 0x20c   : >> { %v545_v54 = vld [vmem:[%s544_s14] sm:$0xff]  ;;  %s601_s14 = smov [#allocation19] }
 0x20d   : >> { %v769_v55 = vld [vmem:[%s768_s19] sm:$0xff]  ;;  %v556_v59 = vmul.f32 %v552_v49, %v545_v54  ;;  %v559_v60 = vmul.f32 %v553_v50, %v545_v54  ;;  %v566_v61 = vmul.f32 %v555_v51, %v545_v54  ;;  %v563_v4 = vmul.f32 %v554_v58, %v545_v54  ;;  %s615_s19 = smov [#allocation13] }
 0x20e   : >> { %v780_v62 = vmul.f32 %v776_v52, %v769_v55  ;;  %v783_v63 = vmul.f32 %v777_v53, %v769_v55  ;;  %v787_v0 = vmul.f32 %v778_v56, %v769_v55  ;;  %v790_v1 = vmul.f32 %v779_v57, %v769_v55  ;;  %v608_v55 = vld [vmem:[%s601_s14] ss:$0 sm:$0xff] }
 0x210   : >> { %v547_v2 = vld [vmem:[%s546_s1] sm:$0xff]  ;;  %s2651_s1 = smov [#allocation15] }
 0x211   : >> { %v771_v3 = vld [vmem:[%s770_s26] sm:$0xff]  ;;  %v560_v5 = vmul.f32 %v555_v51, %v547_v2  ;;  %v562_v6 = vmul.f32 %v552_v49, %v547_v2  ;;  %v565_v7 = vmul.f32 %v553_v50, %v547_v2  ;;  %v557_v14 = vmul.f32 %v554_v58, %v547_v2  ;;  %s720_s26 = smov [#allocation12] }
 0x212   : >> { %v781_v8 = vmul.f32 %v778_v56, %v771_v3  ;;  %v784_v9 = vmul.f32 %v779_v57, %v771_v3  ;;  %v786_v12 = vmul.f32 %v776_v52, %v771_v3  ;;  %v789_v13 = vmul.f32 %v777_v53, %v771_v3 }
 0x213   : >> { %v561_v15 = vsub.f32 %v559_v60, %v560_v5  ;;  %v567_v16 = vadd.f32 %v566_v61, %v565_v7  ;;  %v564_v18 = vadd.f32 %v563_v4, %v562_v6  ;;  %v558_v22 = vsub.f32 %v556_v59, %v557_v14 }
 0x214   : >> { %v782_v17 = vsub.f32 %v780_v62, %v781_v8  ;;  %v785_v19 = vsub.f32 %v783_v63, %v784_v9  ;;  %v788_v20 = vadd.f32 %v787_v0, %v786_v12  ;;  %v791_v21 = vadd.f32 %v790_v1, %v789_v13 }
 0x215   : >> { %569 = vst [vmem:[%s2572_s17] sm:$0xff] %v561_v15  ;;  %571 = vst [vmem:[%s2574_s18] sm:$0xff] %v567_v16  ;;  %s600_s17 = smov [#allocation12]  ;;  %s641_s18 = smov [#allocation15] }
 0x216   : >> { %792 = vst [vmem:[%s2576_s20] sm:$0xff] %v782_v17  ;;  %570 = vst [vmem:[%s2585_s25] sm:$0xff] %v564_v18  ;;  %s2648_s20 = smov [#allocation14]  ;;  %s2449_s25 = smov 127  }
 0x217   : >> { %793 = vst [vmem:[%s2578_s22] sm:$0xff] %v785_v19  ;;  %794 = vst [vmem:[%s2580_s23] sm:$0xff] %v788_v20  ;;  %s656_s22 = smov [#allocation12]  ;;  %s2448_s23 = smov 1  }
 0x218   : >> { %795 = vst [vmem:[%s2583_s24] sm:$0xff] %v791_v21  ;;  %568 = vst [vmem:[%s2570_s15] sm:$0xff] %v558_v22  ;;  %s642_s15 = smov [#allocation20]  ;;  %s657_s24 = smov [#allocation13] }
 0x219   : >> { %v649_v56 = vld [vmem:[%s642_s15] ss:$0 sm:$0xff] }
 0x21c   : >> { %v583_v39 = vld [vmem:[%s2610_s12] sm:$0xff] }
 0x21d   : >> { %v798_v25 = vld [vmem:[%s796_s27] ss:$0 sm:$0xff]  ;;  %v1627_v27 = vld [vmem:[%s796_s27 + $0x7] ss:$0 sm:$0xff]  ;;  %v591_v42 = vmul.f32 %v583_v39, %v575_v24  ;;  %v594_v46 = vmul.f32 %v583_v39, %v573_v23 }
 0x21e   : >> { %v1626_v26 = vld [vmem:[%s796_s27 - $0x1] sm:$0xfe]  ;;  %v1631_v34 = vld [vmem:[%s2602_s2 + $0x7] ss:$0 sm:$0xff] }
 0x21f   : >> { %v805_v28 = vsel %vm728_vm14, %v798_v25, %v1626_v26  ;;  %v809_v29 = vld [vmem:[%s797_s28] ss:$0 sm:$0xff]  ;;  %v1629_v30 = vld [vmem:[%s797_s28 + $0x1] sm:$0x7f] }
 0x220   : >> { %v822_v31 = vld [vmem:[%s2602_s2] ss:$0 sm:$0xff]  ;;  %808 = vst [vmem:[%s796_s27] sm:$0xff] %v805_v28  ;;  %v817_v32 = vsel %vm740_vm15, %v1627_v27, %v1629_v30  ;;  %v1633_v37 = vld [vmem:[%s2604_s10 + $0x1] sm:$0x7f] }
 0x221   : >> { %v1630_v33 = vld [vmem:[%s2602_s2 - $0x1] sm:$0xfe]  ;;  %1628 = vst [vmem:[%s796_s27 + $0x1] sm:$0x1] %v809_v29  ;;  %819 = vst [vmem:[%s797_s28] sm:$0xff] %v817_v32  ;;  %v841_v40 = vsel %vm740_vm15, %v1631_v34, %v1633_v37  ;;  %s744_s27 = smov [#allocation13]  ;;  %s721_s28 = smov [#allocation14] }
 0x222   : >> { %v833_v35 = vld [vmem:[%s2604_s10] ss:$0 sm:$0xff]  ;;  %v829_v36 = vsel %vm728_vm14, %v822_v31, %v1630_v33 }
 0x223   : >> { %v582_v38 = vld [vmem:[%s2608_s11] sm:$0xff]  ;;  %832 = vst [vmem:[%s2602_s2] sm:$0xff] %v829_v36  ;;  %843 = vst [vmem:[%s2604_s10] sm:$0xff] %v841_v40  ;;  %s328_s10 = smov (%p401_p5), [#allocation13] }
 0x224   : >> { %v590_v41 = vmul.f32 %v582_v38, %v573_v23  ;;  %v593_v43 = vmul.f32 %v582_v38, %v575_v24  ;;  %v580_v44 = vld [vmem:[%s2612_s3] sm:$0xff]  ;;  %1632 = vst [vmem:[%s2602_s2 + $0x1] sm:$0x1] %v833_v35  ;;  %s309_s2 = smov (%p401_p5), [#allocation12] }
 0x225   : >> { %v581_v45 = vld [vmem:[%s2614_s13] sm:$0xff]  ;;  %v584_v47 = vmul.f32 %v580_v44, %v573_v23  ;;  %v587_v49 = vmul.f32 %v580_v44, %v575_v24 }
 0x226   : >> { %v585_v48 = vmul.f32 %v581_v45, %v575_v24  ;;  %v592_v50 = vsub.f32 %v590_v41, %v591_v42  ;;  %v588_v51 = vmul.f32 %v581_v45, %v573_v23  ;;  %v595_v52 = vadd.f32 %v594_v46, %v593_v43 }
 0x228   : >> { %v586_v53 = vsub.f32 %v584_v47, %v585_v48  ;;  %598 = vst [vmem:[%s2608_s11] sm:$0xff] %v592_v50  ;;  %v589_v54 = vadd.f32 %v588_v51, %v587_v49  ;;  %599 = vst [vmem:[%s2610_s12] sm:$0xff] %v595_v52  ;;  %s345_s11 = smov (%p401_p5), [#allocation14]  ;;  %s362_s12 = smov (%p401_p5), [#allocation15] }
 0x22a   : >> { %596 = vst [vmem:[%s2612_s3] sm:$0xff] %v586_v53  ;;  %597 = vst [vmem:[%s2614_s13] sm:$0xff] %v589_v54 }
 0x22f   : >> { %v635_v57 = vld [vmem:[%s628_s16] sm:$0xff] }
 0x230   : >> { %v639_v58 = vsel %vm638_vm0, 0.0, %v635_v57  ;;  %v650_v60 = vld [vmem:[%s641_s18] sm:$0xff] }
 0x231   : >> { %v609_v59 = vld [vmem:[%s600_s17] sm:$0xff]  ;;  %640 = vst [vmem:[%s628_s16] sm:$0xff] %v639_v58  ;;  %v654_v63 = vsel %vm653_vm3, %v649_v56, %v650_v60 }
 0x232   : >> { %v613_v61 = vsel %vm612_vm1, %v608_v55, %v609_v59  ;;  %v622_v62 = vld [vmem:[%s615_s19] sm:$0xff]  ;;  %655 = vst [vmem:[%s641_s18] sm:$0xff] %v654_v63 }
 0x233   : >> { %614 = vst [vmem:[%s600_s17] sm:$0xff] %v613_v61  ;;  %v626_v0 = vsel %vm625_vm4, 0.0, %v622_v62 }
 0x234   : >> { %627 = vst [vmem:[%s615_s19] sm:$0xff] %v626_v0 }
 0x238   : >> { %v694_v1 = vld [vmem:[%s2648_s20] sm:$0xff] }
 0x239   : >> { %695 = vrot.lane.b32.xlu0 %v694_v1, %s2448_s23  ;;  %v690_v4 = vld [vmem:[%s2651_s1] sm:$0xff] }
 0x23a   : >> { %v662_v2 = vld [vmem:[%s656_s22] sm:$0xff] }
 0x23b   : >> { %663 = vrot.lane.b32.xlu1 %v662_v2, %s2448_s23  ;;  %v658_v3 = vld [vmem:[%s657_s24] sm:$0xff] }
 0x23f   : >> { %659 = vrot.lane.b32.xlu1 %v658_v3, %s2448_s23 }
 0x243   : >> { %680 = vrot.lane.b32.xlu1 %v658_v3, %s2449_s25 }
 0x247   : >> { %691 = vrot.lane.b32.xlu1 %v690_v4, %s2448_s23 }
 0x24b   : >> { %712 = vrot.lane.b32.xlu1 %v690_v4, %s2449_s25 }
 0x2ab   : >> { %v696_v13 = vpop.permute.xlu0 %695 }
 0x2ac   : >> { %v700_v15 = vsel %vm667_vm5, %v694_v1, %v696_v13 }
 0x2ad   : >> { %v664_v5 = vpop.permute.xlu1 %663 }
 0x2ae   : >> { %v668_v6 = vsel %vm667_vm5, %v662_v2, %v664_v5 }
 0x2b1   : >> { %v660_v7 = vpop.permute.xlu1 %659 }
 0x2b2   : >> { %v672_v8 = vsel %vm671_vm6, %v660_v7, %v668_v6 }
 0x2b3   : >> { %v678_v9 = vsel %vm1405_vm2, %v672_v8, 0.0 }
 0x2b4   : >> { %686 = vst [vmem:[%s656_s22] sm:$0xff] %v678_v9 }
 0x2b5   : >> { %v681_v12 = vpop.permute.xlu1 %680 }
 0x2b6   : >> { %v685_v14 = vsel %vm684_vm7, %v662_v2, %v681_v12 }
 0x2b7   : >> { %687 = vst [vmem:[%s657_s24] sm:$0xff] %v685_v14 }
 0x2b9   : >> { %v692_v16 = vpop.permute.xlu1 %691 }
 0x2ba   : >> { %v704_v17 = vsel %vm671_vm6, %v692_v16, %v700_v15 }
 0x2bb   : >> { %v722_v18 = vld [vmem:[%s720_s26] ss:$0 sm:$0xff]  ;;  %v1619_v20 = vld [vmem:[%s720_s26 + $0x7] ss:$0 sm:$0xff]  ;;  %v710_v22 = vsel %vm1405_vm2, %v704_v17, 0.0 }
 0x2bc   : >> { %v1618_v19 = vld [vmem:[%s720_s26 - $0x1] sm:$0xfe]  ;;  %718 = vst [vmem:[%s2648_s20] sm:$0xff] %v710_v22 }
 0x2bd   : >> { %v729_v21 = vsel %vm728_vm14, %v722_v18, %v1618_v19  ;;  %v713_v23 = vpop.permute.xlu1 %712 }
 0x2be   : >> { %732 = vst [vmem:[%s720_s26] sm:$0xff] %v729_v21  ;;  %v746_v24 = vld [vmem:[%s744_s27] ss:$0 sm:$0xff]  ;;  %v1623_v26 = vld [vmem:[%s744_s27 + $0x7] ss:$0 sm:$0xff]  ;;  %v717_v27 = vsel %vm684_vm7, %v694_v1, %v713_v23 }
 0x2bf   : >> { %v1622_v25 = vld [vmem:[%s744_s27 - $0x1] sm:$0xfe]  ;;  %719 = vst [vmem:[%s2651_s1] sm:$0xff] %v717_v27 }
 0x2c0   : >> { %v753_v28 = vsel %vm728_vm14, %v746_v24, %v1622_v25 }
 0x2c1   : >> { %756 = vst [vmem:[%s744_s27] sm:$0xff] %v753_v28 }
 0x2c3   : >> { %v733_v29 = vld [vmem:[%s721_s28] ss:$0 sm:$0xff]  ;;  %v1621_v30 = vld [vmem:[%s721_s28 + $0x1] sm:$0x7f] }
 0x2c4   : >> { %1620 = vst [vmem:[%s720_s26 + $0x1] sm:$0x1] %v733_v29  ;;  %v741_v31 = vsel %vm740_vm15, %v1619_v20, %v1621_v30  ;;  %403 = sbr.rel (!%p401_p5) target bundleno = 276 (0x114), region = 435 }
 0x2c5   : >> { %743 = vst [vmem:[%s721_s28] sm:$0xff] %v741_v31 }
 0x2c6   : >> { %v757_v32 = vld [vmem:[%s745_s29] ss:$0 sm:$0xff]  ;;  %v1625_v33 = vld [vmem:[%s745_s29 + $0x1] sm:$0x7f] }
 0x2c7   : >> { %1624 = vst [vmem:[%s744_s27 + $0x1] sm:$0x1] %v757_v32  ;;  %v765_v34 = vsel %vm740_vm15, %v1623_v26, %v1625_v33 }
 0x2c8   : >> { %767 = vst [vmem:[%s745_s29] sm:$0xff] %v765_v34 }
 0x2cb   : > { %v315_v35 = vld [vmem:[%s309_s2] sm:$0xff] }
 0x2cc   : > { %v316_v37 = vsel %vm1405_vm2, %v315_v35, 0.0  ;;  %v351_v39 = vld [vmem:[%s345_s11] sm:$0xff] }
 0x2cd   : > { %v317_v41 = vmul.f32 %v316_v37, %v316_v37  ;;  %v352_v43 = vsel %vm1405_vm2, %v351_v39, 0.0 }
 0x2ce   : > { %v334_v36 = vld [vmem:[%s328_s10] sm:$0xff]  ;;  %v353_v45 = vmul.f32 %v352_v43, %v352_v43 }
 0x2cf   : > { %v335_v38 = vsel %vm1405_vm2, %v334_v36, 0.0  ;;  %v368_v40 = vld [vmem:[%s362_s12] sm:$0xff]  ;;  %v321_v48 = vsel %vm320_vm8, 0.0, %v317_v41 }
 0x2d0   : > { %v336_v42 = vmul.f32 %v335_v38, %v335_v38  ;;  %v369_v44 = vsel %vm1405_vm2, %v368_v40, 0.0 }
 0x2d1   : > { %v370_v47 = vmul.f32 %v369_v44, %v369_v44 }
 0x2d2   : > { %v338_v46 = vadd.f32 %v336_v42, %v317_v41  ;;  %v337_v49 = vadd.f32 %v336_v42, %v321_v48 }
 0x2d3   : > { %v374_v52 = vsel %vm373_vm9, 0.0, %v370_v47 }
 0x2d4   : > { %v355_v50 = vadd.f32 %v353_v45, %v338_v46  ;;  %v354_v51 = vadd.f32 %v353_v45, %v337_v49 }
 0x2d6   : > { %v376_v53 = vadd.f32 %v370_v47, %v355_v50  ;;  %v375_v54 = vadd.f32 %v374_v52, %v354_v51 }
 0x2d8   : > { %377 = vadd.xlane.f32.xlu0 %v376_v53 }
 0x2dc   : > { %385 = vadd.xlane.f32.xlu0 %v375_v54 }
 0x365   : > { %v378_v55 = vpop.xlane.xlu0 %377 }
 0x366   : > { %v379_v56 = vrot.slane %v378_v55, 4 }
 0x368   : > { %v380_v57 = vadd.f32 %v379_v56, %v378_v55 }
 0x369   : > { %v386_v58 = vpop.xlane.xlu0 %385 }
 0x36a   : > { %v381_v59 = vrot.slane %v380_v57, 2  ;;  %v387_v60 = vrot.slane %v386_v58, 4 }
 0x36c   : > { %v388_v61 = vadd.f32 %v387_v60, %v386_v58  ;;  %v382_v62 = vadd.f32 %v381_v59, %v380_v57 }
 0x36e   : > { %v389_v63 = vrot.slane %v388_v61, 2  ;;  %v383_v1 = vrot.slane %v382_v62, 1 }
 0x370   : > { %v390_v0 = vadd.f32 %v389_v63, %v388_v61  ;;  %v384_v4 = vadd.f32 %v383_v1, %v382_v62 }
 0x372   : > { %v391_v2 = vrot.slane %v390_v0, 1 }
 0x374   : > { %v392_v3 = vadd.f32 %v391_v2, %v390_v0 }
 0x376   : > { %1660 = vpush %v392_v3 }
 0x377   : > { %1662 = vpush %v384_v4 }
 0x3a7   : > { %s1661_s21 = spop %1660 }
 0x3a8   : > { %s1663_s3 = spop %1662 }
 0x3a9   : > { %s395_s13 = smul.f32 1e-10, %s1663_s3 }
 0x3ab   : > { %p396_p7 = scmp.le.f32.partialorder %s1661_s21, %s395_s13 }
 0x3ad   : > { %p398_p8 = por %p397_p6, %p396_p7 }
 0x3af   :  { %846 = sbr.rel (!%p398_p8) target bundleno = 275 (0x113), region = 446 }
 0x3b6 PF:  { %s847_s14 = smov [#allocation12]  ;;  %v851_v10 = vmov %v2524_v10  ;;  %v854_v11 = vmov %v2526_v11  ;;  %s867_s15 = smov [#allocation15] }
 0x3b7   :  { %v871_v10 = vmov %v2524_v10  ;;  %v874_v11 = vmov %v2526_v11  ;;  %v855_v5 = vld [vmem:[%s847_s14] sm:$0xff]  ;;  %vm858_vm10 = vcmp.eq.s32.totalorder %v854_v11, %v851_v10  ;;  %s848_s0 = smov [#allocation4]  ;;  %s868_s16 = smov [#allocation6] }
 0x3b8   :  { %vm878_vm11 = vcmp.eq.s32.totalorder %v874_v11, %v871_v10  ;;  %v859_v6 = vsel %vm858_vm10, %v855_v5, 0.0  ;;  %v875_v7 = vld [vmem:[%s867_s15] sm:$0xff]  ;;  %s2415_s24 = smov %s2730_s6   ;;  %s2419_s25 = smov [#allocation8]  }
 0x3b9   :  { %v860_v8 = vrot.slane %v859_v6, 4  ;;  %v879_v9 = vsel %vm878_vm11, %v875_v7, 0.0 }
 0x3ba   :  { %v880_v12 = vrot.slane %v879_v9, 4 }
 0x3bb   :  { %v861_v13 = vadd.f32 %v860_v8, %v859_v6 }
 0x3bc   :  { %v881_v14 = vadd.f32 %v880_v12, %v879_v9 }
 0x3bd   :  { %v862_v15 = vrot.slane %v861_v13, 2 }
 0x3be   :  { %v882_v16 = vrot.slane %v881_v14, 2 }
 0x3bf   :  { %v863_v17 = vadd.f32 %v862_v15, %v861_v13 }
 0x3c0   :  { %v883_v18 = vadd.f32 %v882_v16, %v881_v14 }
 0x3c1   :  { %v864_v19 = vrot.slane %v863_v17, 1 }
 0x3c2   :  { %v884_v20 = vrot.slane %v883_v18, 1 }
 0x3c3   :  { %v865_v21 = vadd.f32 %v864_v19, %v863_v17 }
 0x3c4   :  { %v885_v22 = vadd.f32 %v884_v20, %v883_v18 }
 0x3c5   :  { %866 = vst [vmem:[%s848_s0] sm:$0x1] %v865_v21 }
 0x3c6   :  { %886 = vst [vmem:[%s868_s16] sm:$0x1] %v885_v22 }
 0x3cc   :  { %v890_v10 = vld [vmem:[#allocation4] sm:$0x1] }
 0x3cd   :  { %892 = vst [vmem:[#allocation5] sm:$0x1] %v890_v10  ;;  %v896_v11 = vld [vmem:[#allocation6] sm:$0x1] }
 0x3ce   :  { %898 = vst [vmem:[#allocation7] sm:$0x1] %v896_v11 }
 0x3d4   :  { %v961_v23 = vld [vmem:[#allocation5] sm:$0x1] }
 0x3d5   :  { %962 = vst [vmem:[%s2728_s4] sm:$0x1] %v961_v23  ;;  %v1025_v24 = vld [vmem:[#allocation7] sm:$0x1] }
 0x3d6   :  { %1026 = vst [vmem:[%s2729_s5] sm:$0x1] %v1025_v24 }
 0x3d7 LB: > { %v1074_v25 = vld [vmem:[%s2421_s25] sm:$0xff]  ;;  %s1076_s25 = scalar_lea.vmem %s2421_s25, 8   ;;  %s2421_s25 = sphi %s2419_s25, %s1076_s25   ;;  %s2417_s24 = sphi %s2415_s24, %s1077_s24  }
 0x3d8   : > { %1075 = vst [vmem:[%s2417_s24] sm:$0xff] %v1074_v25  ;;  %s1077_s24 = scalar_lea.vmem %s2417_s24, 8   ;;  %p1071_p9 = scmp.gt.s32.totalorder %s1076_s25, [#allocation8] }
 0x3d9   :  { %s2423_s5 = smov (%p1071_p9), %s2731_s7   ;;  %s2427_s26 = smov (%p1071_p9), [#allocation9]  }
 0x3da   :  { %1073 = sbr.rel (!%p1071_p9) target bundleno = 983 (0x3d7), region = 512 }
 0x3e1 LB: > { %v1136_v26 = vld [vmem:[%s2429_s26] sm:$0xff]  ;;  %s1138_s26 = scalar_lea.vmem %s2429_s26, 8   ;;  %s2429_s26 = sphi %s2427_s26, %s1138_s26   ;;  %s2425_s5 = sphi %s2423_s5, %s1139_s5  }
 0x3e2   : > { %1137 = vst [vmem:[%s2425_s5] sm:$0xff] %v1136_v26  ;;  %s1139_s5 = scalar_lea.vmem %s2425_s5, 8   ;;  %p1133_p10 = scmp.gt.s32.totalorder %s1138_s26, [#allocation9] }
 0x3e3   :  { %s2431_s28 = smov (%p1133_p10), %s2732_s8   ;;  %s2435_s29 = smov (%p1133_p10), [#allocation10]  }
 0x3e4   :  { %1135 = sbr.rel (!%p1133_p10) target bundleno = 993 (0x3e1), region = 534 }
 0x3eb LB: > { %v1198_v27 = vld [vmem:[%s2437_s29] sm:$0xff]  ;;  %s1200_s29 = scalar_lea.vmem %s2437_s29, 8   ;;  %s2437_s29 = sphi %s2435_s29, %s1200_s29   ;;  %s2433_s28 = sphi %s2431_s28, %s1201_s28  }
 0x3ec   : > { %1199 = vst [vmem:[%s2433_s28] sm:$0xff] %v1198_v27  ;;  %s1201_s28 = scalar_lea.vmem %s2433_s28, 8   ;;  %p1195_p11 = scmp.gt.s32.totalorder %s1200_s29, [#allocation10] }
 0x3ed   :  { %s2439_s2 = smov (%p1195_p11), %s2733_s9   ;;  %s2443_s10 = smov (%p1195_p11), [#allocation11]  }
 0x3ee   :  { %1197 = sbr.rel (!%p1195_p11) target bundleno = 1003 (0x3eb), region = 556 }
 0x3f5 LB: > { %v1260_v28 = vld [vmem:[%s2445_s10] sm:$0xff]  ;;  %s1262_s10 = scalar_lea.vmem %s2445_s10, 8   ;;  %s2445_s10 = sphi %s2443_s10, %s1262_s10   ;;  %s2441_s2 = sphi %s2439_s2, %s1263_s2  }
 0x3f6   : > { %1261 = vst [vmem:[%s2441_s2] sm:$0xff] %v1260_v28  ;;  %s1263_s2 = scalar_lea.vmem %s2441_s2, 8   ;;  %p1257_p12 = scmp.gt.s32.totalorder %s1262_s10, [#allocation11] }
 0x3f8   :  { %1259 = sbr.rel (!%p1257_p12) target bundleno = 1013 (0x3f5), region = 578 }

// kernel: gsr_layer.2
= control target key start
LH: loop header
LB: loop body
LE: loop exit
PB: predicated region body
PF: predicated region fallthrough
CT: control target
= control target key end

     0   :  { %vm32_vm0 = vcmask 130048   ;;  %v242_v19 = vlaneseq  ;;  %s676_s1 = inlined_call_operand.vmem [shape: f32[16,128], index: 1, kind: input, shape index: {}]   ;;  %s677_s0 = inlined_call_operand.vmem [shape: f32[128,16], index: 0, kind: input, shape index: {}]   ;;  %s678_s2 = inlined_call_operand.vmem [shape: f32[128,128], index: 2, kind: output, shape index: {0}]   ;;  %s679_s3 = inlined_call_operand.vmem [shape: f32[128,128], index: 3, kind: output, shape index: {1}]  }
   0x1   :  { %v30_v0 = vld [vmem:[%s676_s1] sm:$0xff]  ;;  %v31_v1 = vld [vmem:[%s676_s1 + $0x8] sm:$0xff]  ;;  %v16_v7 = vld [vmem:[%s677_s0 + $0x10] sm:$0xff] }
   0x2   :  { %v14_v2 = vld [vmem:[%s677_s0] sm:$0xff]  ;;  %v444_v3 = vpack.c.bf16 %v31_v1, %v30_v0  ;;  %v15_v5 = vld [vmem:[%s677_s0 + $0x8] sm:$0xff]  ;;  %v24_v8 = vld [vmem:[%s677_s0 + $0x50] sm:$0xff]  ;;  %v243_v20 = vshrl.u32 %v242_v19, 7  ;;  %v540_v21 = vand.u32 127, %v242_v19 }
   0x3   :  { %420 = vmatprep.mubr.msk.f32.mxu0 %vm32_vm0, %v14_v2  ;;  %v22_v4 = vld [vmem:[%s677_s0 + $0x40] sm:$0xff]  ;;  %v23_v6 = vld [vmem:[%s677_s0 + $0x48] sm:$0xff]  ;;  %v17_v9 = vld [vmem:[%s677_s0 + $0x18] sm:$0xff] }
   0x4   :  { %445 = vmatprep.subr.bf16.mxu0 %v444_v3  ;;  %448 = vmatprep.subr.bf16.mxu1 %v444_v3  ;;  %v25_v10 = vld [vmem:[%s677_s0 + $0x58] sm:$0xff]  ;;  %v18_v11 = vld [vmem:[%s677_s0 + $0x20] sm:$0xff]  ;;  %v19_v13 = vld [vmem:[%s677_s0 + $0x28] sm:$0xff]  ;;  %v244_v22 = vadd.s32 8, %v243_v20  ;;  %v252_v23 = vadd.s32 72, %v243_v20  ;;  %v251_v24 = vadd.s32 64, %v243_v20  ;;  %vm278_vm3 = vcmp.eq.s32.totalorder %v243_v20, %v540_v21 }
   0x5   :  { %447 = vmatpush3.bf16.msra.mxu0 %v444_v3  ;;  %449 = vmatpush3.bf16.msra.mxu1 %v444_v3  ;;  %v26_v12 = vld [vmem:[%s677_s0 + $0x60] sm:$0xff]  ;;  %v27_v14 = vld [vmem:[%s677_s0 + $0x68] sm:$0xff]  ;;  %v20_v15 = vld [vmem:[%s677_s0 + $0x30] sm:$0xff]  ;;  %v246_v25 = vadd.s32 24, %v243_v20  ;;  %v245_v27 = vadd.s32 16, %v243_v20  ;;  %v253_v29 = vadd.s32 80, %v243_v20 }
   0x6   :  { %432 = vmatprep.mubr.msk.f32.mxu1 %vm32_vm0, %v22_v4  ;;  %v28_v16 = vld [vmem:[%s677_s0 + $0x70] sm:$0xff]  ;;  %v21_v17 = vld [vmem:[%s677_s0 + $0x38] sm:$0xff]  ;;  %vm279_vm1 = vcmp.eq.s32.totalorder %v244_v22, %v540_v21  ;;  %vm287_vm2 = vcmp.eq.s32.totalorder %v252_v23, %v540_v21  ;;  %v254_v30 = vadd.s32 88, %v243_v20  ;;  %vm286_vm4 = vcmp.eq.s32.totalorder %v251_v24, %v540_v21 }
   0x7   :  { %v29_v18 = vld [vmem:[%s677_s0 + $0x78] sm:$0xff]  ;;  %vm281_vm5 = vcmp.eq.s32.totalorder %v246_v25, %v540_v21  ;;  %v248_v36 = vadd.s32 40, %v243_v20  ;;  %v247_v39 = vadd.s32 32, %v243_v20  ;;  %v256_v41 = vadd.s32 104, %v243_v20 }
   0x8   :  { %421 = vmatmul.mubr.msk.f32.vlgmr.msra.gmra.mrb[0].mxu0 %vm32_vm0, %v15_v5  ;;  %433 = vmatmul.mubr.msk.f32.vlgmr.msra.gmra.mrb[0].mxu1 %vm32_vm0, %v23_v6  ;;  %vm289_vm6 = vcmp.eq.s32.totalorder %v254_v30, %v540_v21  ;;  %v255_v46 = vadd.s32 96, %v243_v20  ;;  %vm280_vm7 = vcmp.eq.s32.totalorder %v245_v27, %v540_v21  ;;  %vm288_vm8 = vcmp.eq.s32.totalorder %v253_v29, %v540_v21 }
   0x9   :  { %423 = vmatprep.mubr.msk.f32.mxu0 %vm32_vm0, %v16_v7  ;;  %435 = vmatprep.mubr.msk.f32.mxu1 %vm32_vm0, %v24_v8  ;;  %vm283_vm9 = vcmp.eq.s32.totalorder %v248_v36, %v540_v21  ;;  %v249_v52 = vadd.s32 48, %v243_v20  ;;  %v250_v55 = vadd.s32 56, %v243_v20  ;;  %vm291_vm10 = vcmp.eq.s32.totalorder %v256_v41, %v540_v21 }
   0xa   :  { %v257_v61 = vadd.s32 112, %v243_v20  ;;  %v258_v62 = vadd.s32 120, %v243_v20  ;;  %vm282_vm11 = vcmp.eq.s32.totalorder %v247_v39, %v540_v21  ;;  %vm290_vm12 = vcmp.eq.s32.totalorder %v255_v46, %v540_v21 }
   0xb   :  { %vm285_vm13 = vcmp.eq.s32.totalorder %v250_v55, %v540_v21  ;;  %vm284_vm15 = vcmp.eq.s32.totalorder %v249_v52, %v540_v21 }
   0xc   :  { %424 = vmatmul.mubr.msk.f32.gmra.mrb[2].mxu0 %vm32_vm0, %v17_v9  ;;  %436 = vmatmul.mubr.msk.f32.gmra.mrb[2].mxu1 %vm32_vm0, %v25_v10  ;;  %vm293_vm14 = vcmp.eq.s32.totalorder %v258_v62, %v540_v21 }
   0xd   :  { %426 = vmatprep.mubr.msk.f32.mxu0 %vm32_vm0, %v18_v11  ;;  %438 = vmatprep.mubr.msk.f32.mxu1 %vm32_vm0, %v26_v12 }
  0x10   :  { %427 = vmatmul.mubr.msk.f32.gmra.mrb[4].mxu0 %vm32_vm0, %v19_v13  ;;  %439 = vmatmul.mubr.msk.f32.gmra.mrb[4].mxu1 %vm32_vm0, %v27_v14 }
  0x11   :  { %429 = vmatprep.mubr.msk.f32.mxu0 %vm32_vm0, %v20_v15  ;;  %441 = vmatprep.mubr.msk.f32.mxu1 %vm32_vm0, %v28_v16 }
  0x14   :  { %430 = vmatmul.mubr.msk.f32.gmra.mrb[6].mxu0 %vm32_vm0, %v21_v17  ;;  %442 = vmatmul.mubr.msk.f32.gmra.mrb[6].mxu1 %vm32_vm0, %v29_v18  ;;  %vm292_vm0 = vcmp.eq.s32.totalorder %v257_v61, %v540_v21 }
  0xdb   :  { %v422_v26 = vpop.f32.mrb[0].mxu0  ;;  %v434_v28 = vpop.f32.mrb[0].mxu1 }
  0xdc   :  { %v227_v31 = vand.u32 2147483647, %v422_v26  ;;  %v147_v32 = vpop.f32.mrb[1].mxu0  ;;  %v235_v33 = vand.u32 2147483647, %v434_v28  ;;  %v187_v34 = vpop.f32.mrb[1].mxu1 }
  0xdd   :  { %v226_v35 = vand.u32 2147483647, %v147_v32  ;;  %v234_v37 = vand.u32 2147483647, %v187_v34 }
  0xde   :  { %v295_v38 = vsel %vm279_vm1, 1.0, %v227_v31  ;;  %v551_v40 = vsel %vm287_vm2, 1.0, %v235_v33 }
  0xdf   :  { %v294_v42 = vsel %vm278_vm3, 1.0, %v226_v35  ;;  %v425_v43 = vpop.f32.mrb[2].mxu0  ;;  %311 = vst [vmem:[%s678_s2 + $0x8] sm:$0xff] %v295_v38  ;;  %v556_v44 = vsel %vm286_vm4, 1.0, %v234_v37  ;;  %v437_v45 = vpop.f32.mrb[2].mxu1  ;;  %319 = vst [vmem:[%s678_s2 + $0x48] sm:$0xff] %v551_v40 }
  0xe0   :  { %310 = vst [vmem:[%s678_s2] sm:$0xff] %v294_v42  ;;  %326 = vxpose.xlu0.b32.start [1/16] %v294_v42, 128  ;;  %v229_v47 = vand.u32 2147483647, %v425_v43  ;;  %v157_v48 = vpop.f32.mrb[3].mxu0  ;;  %318 = vst [vmem:[%s678_s2 + $0x40] sm:$0xff] %v556_v44  ;;  %v237_v49 = vand.u32 2147483647, %v437_v45 }
  0xe1   :  { %v197_v50 = vpop.f32.mrb[3].mxu1  ;;  %v228_v51 = vand.u32 2147483647, %v157_v48 }
  0xe2   :  { %v236_v53 = vand.u32 2147483647, %v197_v50  ;;  %v297_v54 = vsel %vm281_vm5, 1.0, %v229_v47  ;;  %v305_v56 = vsel %vm289_vm6, 1.0, %v237_v49 }
  0xe3   :  { %v296_v57 = vsel %vm280_vm7, 1.0, %v228_v51  ;;  %v428_v58 = vpop.f32.mrb[4].mxu0  ;;  %313 = vst [vmem:[%s678_s2 + $0x18] sm:$0xff] %v297_v54  ;;  %v440_v60 = vpop.f32.mrb[4].mxu1  ;;  %321 = vst [vmem:[%s678_s2 + $0x58] sm:$0xff] %v305_v56 }
  0xe4   :  { %v304_v59 = vsel %vm288_vm8, 1.0, %v236_v53  ;;  %327 = vxpose.xlu0.b32.cont [2/16] %v295_v38, 128  ;;  %312 = vst [vmem:[%s678_s2 + $0x10] sm:$0xff] %v296_v57  ;;  %v231_v63 = vand.u32 2147483647, %v428_v58  ;;  %v167_v0 = vpop.f32.mrb[5].mxu0  ;;  %v207_v2 = vpop.f32.mrb[5].mxu1 }
  0xe5   :  { %320 = vst [vmem:[%s678_s2 + $0x50] sm:$0xff] %v304_v59  ;;  %v239_v1 = vand.u32 2147483647, %v440_v60  ;;  %v230_v3 = vand.u32 2147483647, %v167_v0 }
  0xe6   :  { %v238_v4 = vand.u32 2147483647, %v207_v2  ;;  %v299_v5 = vsel %vm283_vm9, 1.0, %v231_v63 }
  0xe7   :  { %v307_v6 = vsel %vm291_vm10, 1.0, %v239_v1  ;;  %v298_v7 = vsel %vm282_vm11, 1.0, %v230_v3  ;;  %v431_v8 = vpop.f32.mrb[6].mxu0  ;;  %315 = vst [vmem:[%s678_s2 + $0x28] sm:$0xff] %v299_v5  ;;  %v443_v10 = vpop.f32.mrb[6].mxu1 }
  0xe8   :  { %v306_v9 = vsel %vm290_vm12, 1.0, %v238_v4  ;;  %323 = vst [vmem:[%s678_s2 + $0x68] sm:$0xff] %v307_v6  ;;  %328 = vxpose.xlu0.b32.cont [3/16] %v296_v57, 128  ;;  %314 = vst [vmem:[%s678_s2 + $0x20] sm:$0xff] %v298_v7  ;;  %v233_v11 = vand.u32 2147483647, %v431_v8  ;;  %v177_v12 = vpop.f32.mrb[7].mxu0 }
  0xe9   :  { %322 = vst [vmem:[%s678_s2 + $0x60] sm:$0xff] %v306_v9  ;;  %v241_v13 = vand.u32 2147483647, %v443_v10  ;;  %v217_v14 = vpop.f32.mrb[7].mxu1  ;;  %v232_v15 = vand.u32 2147483647, %v177_v12 }
  0xea   :  { %v240_v16 = vand.u32 2147483647, %v217_v14  ;;  %v301_v17 = vsel %vm285_vm13, 1.0, %v233_v11 }
  0xeb   :  { %v309_v18 = vsel %vm293_vm14, 1.0, %v241_v13  ;;  %v300_v19 = vsel %vm284_vm15, 1.0, %v232_v15  ;;  %317 = vst [vmem:[%s678_s2 + $0x38] sm:$0xff] %v301_v17 }
  0xec   :  { %v308_v20 = vsel %vm292_vm0, 1.0, %v240_v16  ;;  %325 = vst [vmem:[%s678_s2 + $0x78] sm:$0xff] %v309_v18  ;;  %329 = vxpose.xlu0.b32.cont [4/16] %v297_v54, 128  ;;  %316 = vst [vmem:[%s678_s2 + $0x30] sm:$0xff] %v300_v19 }
  0xed   :  { %324 = vst [vmem:[%s678_s2 + $0x70] sm:$0xff] %v308_v20 }
  0xf0   :  { %330 = vxpose.xlu0.b32.cont [5/16] %v298_v7, 128 }
  0xf4   :  { %331 = vxpose.xlu0.b32.cont [6/16] %v299_v5, 128 }
  0xf8   :  { %332 = vxpose.xlu0.b32.cont [7/16] %v300_v19, 128 }
  0xfc   :  { %333 = vxpose.xlu0.b32.cont [8/16] %v301_v17, 128 }
 0x100   :  { %334 = vxpose.xlu0.b32.cont [9/16] %v556_v44, 128 }
 0x104   :  { %335 = vxpose.xlu0.b32.cont [10/16] %v551_v40, 128 }
 0x108   :  { %336 = vxpose.xlu0.b32.cont [11/16] %v304_v59, 128 }
 0x10c   :  { %337 = vxpose.xlu0.b32.cont [12/16] %v305_v56, 128 }
 0x110   :  { %338 = vxpose.xlu0.b32.cont [13/16] %v306_v9, 128 }
 0x114   :  { %339 = vxpose.xlu0.b32.cont [14/16] %v307_v6, 128 }
 0x118   :  { %340 = vxpose.xlu0.b32.cont [15/16] %v308_v20, 128 }
 0x11c   :  { %341 = vxpose.xlu0.b32.end [16/16] %v309_v18, 128 }
 0x160   :  { %v342_v21 = vpop.trf.xlu0 }
 0x161   :  { %358 = vst [vmem:[%s679_s3] sm:$0xff] %v342_v21 }
 0x164   :  { %v343_v22 = vpop.trf.xlu0 }
 0x165   :  { %359 = vst [vmem:[%s679_s3 + $0x8] sm:$0xff] %v343_v22 }
 0x168   :  { %v344_v23 = vpop.trf.xlu0 }
 0x169   :  { %360 = vst [vmem:[%s679_s3 + $0x10] sm:$0xff] %v344_v23 }
 0x16c   :  { %v345_v24 = vpop.trf.xlu0 }
 0x16d   :  { %361 = vst [vmem:[%s679_s3 + $0x18] sm:$0xff] %v345_v24 }
 0x170   :  { %v346_v25 = vpop.trf.xlu0 }
 0x171   :  { %362 = vst [vmem:[%s679_s3 + $0x20] sm:$0xff] %v346_v25 }
 0x174   :  { %v347_v26 = vpop.trf.xlu0 }
 0x175   :  { %363 = vst [vmem:[%s679_s3 + $0x28] sm:$0xff] %v347_v26 }
 0x178   :  { %v348_v27 = vpop.trf.xlu0 }
 0x179   :  { %364 = vst [vmem:[%s679_s3 + $0x30] sm:$0xff] %v348_v27 }
 0x17c   :  { %v349_v28 = vpop.trf.xlu0 }
 0x17d   :  { %365 = vst [vmem:[%s679_s3 + $0x38] sm:$0xff] %v349_v28 }
 0x180   :  { %v350_v29 = vpop.trf.xlu0 }
 0x181   :  { %366 = vst [vmem:[%s679_s3 + $0x40] sm:$0xff] %v350_v29 }
 0x184   :  { %v351_v30 = vpop.trf.xlu0 }
 0x185   :  { %367 = vst [vmem:[%s679_s3 + $0x48] sm:$0xff] %v351_v30 }
 0x188   :  { %v352_v31 = vpop.trf.xlu0 }
 0x189   :  { %368 = vst [vmem:[%s679_s3 + $0x50] sm:$0xff] %v352_v31 }
 0x18c   :  { %v353_v32 = vpop.trf.xlu0 }
 0x18d   :  { %369 = vst [vmem:[%s679_s3 + $0x58] sm:$0xff] %v353_v32 }
 0x190   :  { %v354_v33 = vpop.trf.xlu0 }
 0x191   :  { %370 = vst [vmem:[%s679_s3 + $0x60] sm:$0xff] %v354_v33 }
 0x194   :  { %v355_v34 = vpop.trf.xlu0 }
 0x195   :  { %371 = vst [vmem:[%s679_s3 + $0x68] sm:$0xff] %v355_v34 }
 0x198   :  { %v356_v35 = vpop.trf.xlu0 }
 0x199   :  { %372 = vst [vmem:[%s679_s3 + $0x70] sm:$0xff] %v356_v35 }
 0x19c   :  { %v357_v36 = vpop.trf.xlu0 }
 0x19d   :  { %373 = vst [vmem:[%s679_s3 + $0x78] sm:$0xff] %v357_v36 }

// kernel: gsr_layer.3
= control target key start
LH: loop header
LB: loop body
LE: loop exit
PB: predicated region body
PF: predicated region fallthrough
CT: control target
= control target key end

     0   :  { %v189_v40 = vlaneseq  ;;  %s630_s1 = inlined_call_operand.vmem [shape: f32[128,128], index: 1, kind: input, shape index: {}]   ;;  %s631_s0 = inlined_call_operand.vmem [shape: f32[128,128], index: 0, kind: input, shape index: {}]   ;;  %s632_s2 = inlined_call_operand.vmem [shape: f32[128,128], index: 2, kind: output, shape index: {}]  }
   0x1   :  { %v28_v0 = vld [vmem:[%s630_s1] sm:$0xff]  ;;  %v29_v1 = vld [vmem:[%s630_s1 + $0x8] sm:$0xff]  ;;  %v30_v2 = vld [vmem:[%s630_s1 + $0x10] sm:$0xff] }
   0x2   :  { %v381_v3 = vpack.c.bf16 %v29_v1, %v28_v0  ;;  %v31_v4 = vld [vmem:[%s630_s1 + $0x18] sm:$0xff]  ;;  %v32_v6 = vld [vmem:[%s630_s1 + $0x20] sm:$0xff]  ;;  %v33_v7 = vld [vmem:[%s630_s1 + $0x28] sm:$0xff]  ;;  %v190_v41 = vshrl.u32 %v189_v40, 7  ;;  %v540_v43 = vand.u32 127, %v189_v40 }
   0x3   :  { %v385_v5 = vpack.c.bf16 %v31_v4, %v30_v2  ;;  %v389_v8 = vpack.c.bf16 %v33_v7, %v32_v6  ;;  %v12_v9 = vld [vmem:[%s631_s0] sm:$0xff]  ;;  %v34_v11 = vld [vmem:[%s630_s1 + $0x30] sm:$0xff]  ;;  %v35_v12 = vld [vmem:[%s630_s1 + $0x38] sm:$0xff] }
   0x4   :  { %382 = vmatprep.subr.bf16.mxu0 %v381_v3  ;;  %413 = vmatprep.subr.bf16.mxu1 %v381_v3  ;;  %v20_v10 = vld [vmem:[%s631_s0 + $0x40] sm:$0xff]  ;;  %v393_v13 = vpack.c.bf16 %v35_v12, %v34_v11  ;;  %v37_v15 = vld [vmem:[%s630_s1 + $0x48] sm:$0xff]  ;;  %v38_v17 = vld [vmem:[%s630_s1 + $0x50] sm:$0xff]  ;;  %v191_v42 = vadd.s32 8, %v190_v41  ;;  %v199_v44 = vadd.s32 72, %v190_v41  ;;  %v198_v45 = vadd.s32 64, %v190_v41 }
   0x5   :  { %384 = vmatpush3.bf16.msra.mxu0 %v381_v3  ;;  %421 = vmatpush3.bf16.msra.mxu1 %v381_v3  ;;  %v36_v14 = vld [vmem:[%s630_s1 + $0x40] sm:$0xff]  ;;  %v39_v18 = vld [vmem:[%s630_s1 + $0x58] sm:$0xff]  ;;  %v41_v21 = vld [vmem:[%s630_s1 + $0x68] sm:$0xff]  ;;  %v193_v46 = vadd.s32 24, %v190_v41  ;;  %v201_v47 = vadd.s32 88, %v190_v41  ;;  %vm225_vm2 = vcmp.eq.s32.totalorder %v190_v41, %v540_v43  ;;  %v192_v48 = vadd.s32 16, %v190_v41 }
   0x6   :  { %386 = vmatprep.subr.bf16.mxu0 %v385_v5  ;;  %414 = vmatprep.subr.bf16.mxu1 %v385_v5  ;;  %v397_v16 = vpack.c.bf16 %v37_v15, %v36_v14  ;;  %v401_v19 = vpack.c.bf16 %v39_v18, %v38_v17  ;;  %v40_v20 = vld [vmem:[%s630_s1 + $0x60] sm:$0xff]  ;;  %v42_v23 = vld [vmem:[%s630_s1 + $0x70] sm:$0xff]  ;;  %v43_v24 = vld [vmem:[%s630_s1 + $0x78] sm:$0xff]  ;;  %vm226_vm0 = vcmp.eq.s32.totalorder %v191_v42, %v540_v43  ;;  %v200_v49 = vadd.s32 80, %v190_v41 }
   0x7   :  { %357 = vmatprep.mubr.f32.mxu0 %v12_v9  ;;  %369 = vmatprep.mubr.f32.mxu1 %v20_v10  ;;  %v405_v22 = vpack.c.bf16 %v41_v21, %v40_v20  ;;  %v409_v25 = vpack.c.bf16 %v43_v24, %v42_v23  ;;  %v13_v26 = vld [vmem:[%s631_s0 + $0x8] sm:$0xff]  ;;  %v14_v28 = vld [vmem:[%s631_s0 + $0x10] sm:$0xff]  ;;  %v15_v30 = vld [vmem:[%s631_s0 + $0x18] sm:$0xff]  ;;  %vm234_vm1 = vcmp.eq.s32.totalorder %v199_v44, %v540_v43  ;;  %v195_v52 = vadd.s32 40, %v190_v41 }
   0x8   :  { %v21_v27 = vld [vmem:[%s631_s0 + $0x48] sm:$0xff]  ;;  %v22_v29 = vld [vmem:[%s631_s0 + $0x50] sm:$0xff]  ;;  %v23_v31 = vld [vmem:[%s631_s0 + $0x58] sm:$0xff]  ;;  %vm233_vm3 = vcmp.eq.s32.totalorder %v198_v45, %v540_v43  ;;  %v203_v53 = vadd.s32 104, %v190_v41  ;;  %v194_v54 = vadd.s32 32, %v190_v41  ;;  %v202_v55 = vadd.s32 96, %v190_v41 }
   0x9   :  { %388 = vmatpush3.bf16.msra.mxu0 %v385_v5  ;;  %422 = vmatpush3.bf16.msra.mxu1 %v385_v5  ;;  %v16_v32 = vld [vmem:[%s631_s0 + $0x20] sm:$0xff]  ;;  %v17_v34 = vld [vmem:[%s631_s0 + $0x28] sm:$0xff]  ;;  %v18_v36 = vld [vmem:[%s631_s0 + $0x30] sm:$0xff]  ;;  %vm228_vm4 = vcmp.eq.s32.totalorder %v193_v46, %v540_v43  ;;  %vm236_vm5 = vcmp.eq.s32.totalorder %v201_v47, %v540_v43  ;;  %vm227_vm6 = vcmp.eq.s32.totalorder %v192_v48, %v540_v43  ;;  %v205_v9 = vadd.s32 120, %v190_v41 }
   0xa   :  { %390 = vmatprep.subr.bf16.mxu0 %v389_v8  ;;  %415 = vmatprep.subr.bf16.mxu1 %v389_v8  ;;  %v24_v33 = vld [vmem:[%s631_s0 + $0x60] sm:$0xff]  ;;  %v25_v35 = vld [vmem:[%s631_s0 + $0x68] sm:$0xff]  ;;  %v26_v37 = vld [vmem:[%s631_s0 + $0x70] sm:$0xff]  ;;  %vm235_vm7 = vcmp.eq.s32.totalorder %v200_v49, %v540_v43  ;;  %vm230_vm8 = vcmp.eq.s32.totalorder %v195_v52, %v540_v43  ;;  %vm238_vm9 = vcmp.eq.s32.totalorder %v203_v53, %v540_v43  ;;  %v204_v17 = vadd.s32 112, %v190_v41 }
   0xb   :  { %v19_v38 = vld [vmem:[%s631_s0 + $0x38] sm:$0xff]  ;;  %vm229_vm10 = vcmp.eq.s32.totalorder %v194_v54, %v540_v43  ;;  %vm237_vm11 = vcmp.eq.s32.totalorder %v202_v55, %v540_v43  ;;  %vm240_vm13 = vcmp.eq.s32.totalorder %v205_v9, %v540_v43 }
   0xc   :  { %v27_v39 = vld [vmem:[%s631_s0 + $0x78] sm:$0xff]  ;;  %vm239_vm15 = vcmp.eq.s32.totalorder %v204_v17, %v540_v43 }
   0xd   :  { %392 = vmatpush3.bf16.msra.mxu0 %v389_v8  ;;  %423 = vmatpush3.bf16.msra.mxu1 %v389_v8  ;;  %v197_v8 = vadd.s32 56, %v190_v41 }
   0xe   :  { %394 = vmatprep.subr.bf16.mxu0 %v393_v13  ;;  %416 = vmatprep.subr.bf16.mxu1 %v393_v13 }
   0xf   :  { %vm232_vm12 = vcmp.eq.s32.totalorder %v197_v8, %v540_v43 }
  0x11   :  { %396 = vmatpush3.bf16.msra.mxu0 %v393_v13  ;;  %424 = vmatpush3.bf16.msra.mxu1 %v393_v13 }
  0x12   :  { %398 = vmatprep.subr.bf16.mxu0 %v397_v16  ;;  %417 = vmatprep.subr.bf16.mxu1 %v397_v16 }
  0x15   :  { %400 = vmatpush3.bf16.msra.mxu0 %v397_v16  ;;  %425 = vmatpush3.bf16.msra.mxu1 %v397_v16  ;;  %v196_v16 = vadd.s32 48, %v190_v41 }
  0x16   :  { %402 = vmatprep.subr.bf16.mxu0 %v401_v19  ;;  %418 = vmatprep.subr.bf16.mxu1 %v401_v19 }
  0x17   :  { %vm231_vm14 = vcmp.eq.s32.totalorder %v196_v16, %v540_v43 }
  0x19   :  { %404 = vmatpush3.bf16.msra.mxu0 %v401_v19  ;;  %426 = vmatpush3.bf16.msra.mxu1 %v401_v19 }
  0x1a   :  { %406 = vmatprep.subr.bf16.mxu0 %v405_v22  ;;  %419 = vmatprep.subr.bf16.mxu1 %v405_v22 }
  0x1d   :  { %408 = vmatpush3.bf16.msra.mxu0 %v405_v22  ;;  %427 = vmatpush3.bf16.msra.mxu1 %v405_v22 }
  0x1e   :  { %410 = vmatprep.subr.bf16.mxu0 %v409_v25  ;;  %420 = vmatprep.subr.bf16.mxu1 %v409_v25 }
  0x21   :  { %412 = vmatpush3.bf16.msra.mxu0 %v409_v25  ;;  %428 = vmatpush3.bf16.msra.mxu1 %v409_v25 }
  0x24   :  { %358 = vmatmul.mubr.f32.vlgmr.msra.gmra.mrb[0].mxu0 %v13_v26  ;;  %370 = vmatmul.mubr.f32.vlgmr.msra.gmra.mrb[0].mxu1 %v21_v27 }
  0x25   :  { %360 = vmatprep.mubr.f32.mxu0 %v14_v28  ;;  %372 = vmatprep.mubr.f32.mxu1 %v22_v29 }
  0x28   :  { %361 = vmatmul.mubr.f32.gmra.mrb[2].mxu0 %v15_v30  ;;  %373 = vmatmul.mubr.f32.gmra.mrb[2].mxu1 %v23_v31 }
  0x29   :  { %363 = vmatprep.mubr.f32.mxu0 %v16_v32  ;;  %375 = vmatprep.mubr.f32.mxu1 %v24_v33 }
  0x2c   :  { %364 = vmatmul.mubr.f32.gmra.mrb[4].mxu0 %v17_v34  ;;  %376 = vmatmul.mubr.f32.gmra.mrb[4].mxu1 %v25_v35 }
  0x2d   :  { %366 = vmatprep.mubr.f32.mxu0 %v18_v36  ;;  %378 = vmatprep.mubr.f32.mxu1 %v26_v37 }
  0x30   :  { %367 = vmatmul.mubr.f32.gmra.mrb[6].mxu0 %v19_v38  ;;  %379 = vmatmul.mubr.f32.gmra.mrb[6].mxu1 %v27_v39 }
  0xf7   :  { %v359_v50 = vpop.f32.mrb[0].mxu0  ;;  %v371_v51 = vpop.f32.mrb[0].mxu1 }
  0xf8   :  { %v242_v56 = vsel %vm226_vm0, 1.0, %v359_v50  ;;  %v250_v57 = vsel %vm234_vm1, 1.0, %v371_v51  ;;  %v110_v58 = vpop.f32.mrb[1].mxu0  ;;  %v150_v59 = vpop.f32.mrb[1].mxu1 }
  0xf9   :  { %v258_v60 = vand.u32 2147483647, %v242_v56  ;;  %v266_v61 = vand.u32 2147483647, %v250_v57  ;;  %v241_v62 = vsel %vm225_vm2, 1.0, %v110_v58  ;;  %v249_v63 = vsel %vm233_vm3, 1.0, %v150_v59 }
  0xfa   :  { %v257_v0 = vand.u32 2147483647, %v241_v62  ;;  %v265_v1 = vand.u32 2147483647, %v249_v63 }
  0xfb   :  { %274 = vst [vmem:[%s632_s2 + $0x8] sm:$0xff] %v258_v60  ;;  %282 = vst [vmem:[%s632_s2 + $0x48] sm:$0xff] %v266_v61  ;;  %v362_v2 = vpop.f32.mrb[2].mxu0  ;;  %v374_v3 = vpop.f32.mrb[2].mxu1 }
  0xfc   :  { %273 = vst [vmem:[%s632_s2] sm:$0xff] %v257_v0  ;;  %281 = vst [vmem:[%s632_s2 + $0x40] sm:$0xff] %v265_v1  ;;  %v244_v4 = vsel %vm228_vm4, 1.0, %v362_v2  ;;  %v252_v5 = vsel %vm236_vm5, 1.0, %v374_v3  ;;  %v120_v6 = vpop.f32.mrb[3].mxu0  ;;  %v160_v7 = vpop.f32.mrb[3].mxu1 }
  0xfd   :  { %v260_v10 = vand.u32 2147483647, %v244_v4  ;;  %v268_v11 = vand.u32 2147483647, %v252_v5  ;;  %v243_v12 = vsel %vm227_vm6, 1.0, %v120_v6  ;;  %v251_v13 = vsel %vm235_vm7, 1.0, %v160_v7 }
  0xfe   :  { %v259_v14 = vand.u32 2147483647, %v243_v12  ;;  %v267_v15 = vand.u32 2147483647, %v251_v13 }
  0xff   :  { %276 = vst [vmem:[%s632_s2 + $0x18] sm:$0xff] %v260_v10  ;;  %284 = vst [vmem:[%s632_s2 + $0x58] sm:$0xff] %v268_v11  ;;  %v365_v18 = vpop.f32.mrb[4].mxu0  ;;  %v377_v19 = vpop.f32.mrb[4].mxu1 }
 0x100   :  { %275 = vst [vmem:[%s632_s2 + $0x10] sm:$0xff] %v259_v14  ;;  %283 = vst [vmem:[%s632_s2 + $0x50] sm:$0xff] %v267_v15  ;;  %v246_v20 = vsel %vm230_vm8, 1.0, %v365_v18  ;;  %v254_v21 = vsel %vm238_vm9, 1.0, %v377_v19  ;;  %v130_v22 = vpop.f32.mrb[5].mxu0  ;;  %v170_v23 = vpop.f32.mrb[5].mxu1 }
 0x101   :  { %v262_v24 = vand.u32 2147483647, %v246_v20  ;;  %v270_v25 = vand.u32 2147483647, %v254_v21  ;;  %v245_v26 = vsel %vm229_vm10, 1.0, %v130_v22  ;;  %v253_v27 = vsel %vm237_vm11, 1.0, %v170_v23 }
 0x102   :  { %v261_v28 = vand.u32 2147483647, %v245_v26  ;;  %v269_v29 = vand.u32 2147483647, %v253_v27 }
 0x103   :  { %278 = vst [vmem:[%s632_s2 + $0x28] sm:$0xff] %v262_v24  ;;  %286 = vst [vmem:[%s632_s2 + $0x68] sm:$0xff] %v270_v25  ;;  %v368_v30 = vpop.f32.mrb[6].mxu0  ;;  %v380_v31 = vpop.f32.mrb[6].mxu1 }
 0x104   :  { %277 = vst [vmem:[%s632_s2 + $0x20] sm:$0xff] %v261_v28  ;;  %285 = vst [vmem:[%s632_s2 + $0x60] sm:$0xff] %v269_v29  ;;  %v248_v32 = vsel %vm232_vm12, 1.0, %v368_v30  ;;  %v256_v33 = vsel %vm240_vm13, 1.0, %v380_v31  ;;  %v140_v34 = vpop.f32.mrb[7].mxu0  ;;  %v180_v35 = vpop.f32.mrb[7].mxu1 }
 0x105   :  { %v264_v36 = vand.u32 2147483647, %v248_v32  ;;  %v272_v37 = vand.u32 2147483647, %v256_v33  ;;  %v247_v38 = vsel %vm231_vm14, 1.0, %v140_v34  ;;  %v255_v39 = vsel %vm239_vm15, 1.0, %v180_v35 }
 0x106   :  { %v263_v40 = vand.u32 2147483647, %v247_v38  ;;  %v271_v41 = vand.u32 2147483647, %v255_v39 }
 0x107   :  { %280 = vst [vmem:[%s632_s2 + $0x38] sm:$0xff] %v264_v36  ;;  %288 = vst [vmem:[%s632_s2 + $0x78] sm:$0xff] %v272_v37 }
 0x108   :  { %279 = vst [vmem:[%s632_s2 + $0x30] sm:$0xff] %v263_v40  ;;  %287 = vst [vmem:[%s632_s2 + $0x70] sm:$0xff] %v271_v41 }

</bundles_post_ra>
